<compile_context>
chip_gen: v7x
topology: tpu7x:2x2x1
jax: 0.10.0
libtpu: 0.0.40
codegen_flags: <defaults>
</compile_context>

<pallas_src>
import functools

import jax
import jax.numpy as jnp
from jax import lax
from jax.experimental import pallas as pl
from jax.experimental.pallas import tpu as pltpu


# ----------------------------------------------------------------------------
# Fused Pallas kernel: embedder GRU + head, then recovery GRU + head.
# ----------------------------------------------------------------------------
def _autoencoder_kernel(x_ref,
                        e_wih, e_whh, e_bi3, e_bhn, e_wfc, e_bfc,
                        r_wih, r_whh, r_bi3, r_bhn, r_wfc, r_bfc,
                        o_ref):
    T, B, F = x_ref.shape          # per-block batch B (multiple of 8)
    H = e_bhn.shape[1]

    def gru_layer(x_flat, wih_ref, whh_ref, bi3_ref, bhn_ref):
        """x_flat: (T*B, in_dim) f32 value -> (T*B, H) f32 hidden sequence."""
        # One fused input projection over all timesteps (bf16 x bf16 -> f32).
        # Folded biases (b_ih[r]+b_hh[r], b_ih[z]+b_hh[z], b_ih[n]) added once.
        gi = jnp.dot(x_flat.astype(jnp.bfloat16), wih_ref[...],
                     preferred_element_type=jnp.float32) + bi3_ref[...]   # (T*B, 3H)

        w_hh = whh_ref[...]            # (H, 3H) bf16, loop-invariant, in vregs
        b_hn = bhn_ref[...]            # (1, H)  f32 (gated by r below)

        # Recurrence: fully unrolled, h carried in registers; no scratch.
        h = jnp.zeros((B, H), jnp.float32)        # h_0 = 0 (PyTorch default)
        hs = []
        for t in range(T):
            gi_t = gi[t * B:(t + 1) * B, :]       # sublane-aligned static slice
            gh = jnp.dot(h.astype(jnp.bfloat16), w_hh,
                         preferred_element_type=jnp.float32)      # (B, 3H)
            # PyTorch gate order [r, z, n]; static lane splits at 0 / H / 2H.
            r = jax.nn.sigmoid(gi_t[:, 0:H] + gh[:, 0:H])
            z = jax.nn.sigmoid(gi_t[:, H:2 * H] + gh[:, H:2 * H])
            n = jnp.tanh(gi_t[:, 2 * H:3 * H] + r * (gh[:, 2 * H:3 * H] + b_hn))
            h = (1.0 - z) * n + z * h
            hs.append(h)
        return jnp.concatenate(hs, axis=0)        # (T*B, H), time-major

    # ---- embedder : GRU(F -> H) + Linear(H -> H) + sigmoid ------------------
    x_flat = x_ref[...].reshape(T * B, F)         # B mult of 8 -> layout-free
    h_emb = gru_layer(x_flat, e_wih, e_whh, e_bi3, e_bhn)
    y_emb = jax.nn.sigmoid(
        jnp.dot(h_emb.astype(jnp.bfloat16), e_wfc[...],
                preferred_element_type=jnp.float32) + e_bfc[...])

    # ---- recovery : GRU(H -> H) + Linear(H -> F) + sigmoid ------------------
    h_rec = gru_layer(y_emb, r_wih, r_whh, r_bi3, r_bhn)
    o = jax.nn.sigmoid(
        jnp.dot(h_rec.astype(jnp.bfloat16), r_wfc[...],
                preferred_element_type=jnp.float32) + r_bfc[...])
    o_ref[...] = o.reshape(o_ref.shape)           # (T, B, F), layout-free


# ----------------------------------------------------------------------------
# Wrapper: pack per-gate params into fused kernel layout + launch.
# ----------------------------------------------------------------------------
def _pack_gru_linear(p, mm_dtype=jnp.bfloat16):
    """Per-gate params -> fused [r|z|n] weights (bf16) + folded biases (f32)."""
    w_ih = jnp.concatenate([p["w_ih"][0], p["w_ih"][1], p["w_ih"][2]], axis=1)
    w_hh = jnp.concatenate([p["w_hh"][0], p["w_hh"][1], p["w_hh"][2]], axis=1)
    b_i3 = jnp.concatenate([p["b_ih"][0] + p["b_hh"][0],
                            p["b_ih"][1] + p["b_hh"][1],
                            p["b_ih"][2]], axis=1)          # (1, 3H) f32
    return (w_ih.astype(mm_dtype), w_hh.astype(mm_dtype), b_i3,
            p["b_hh"][2], p["w_fc"].astype(mm_dtype), p["b_fc"])


def autoencoder_pallas(x_bt, emb_p, rec_p, *, hidden, feat, batch_block=8):
    """x_bt: (B, T, feat) float32 -> X_tilde: (B, T, feat) float32."""
    B, T, F = x_bt.shape
    assert F == feat
    assert B % batch_block == 0, "batch must be a multiple of the 8-row block"

    x_tm = jnp.transpose(x_bt, (1, 0, 2))                    # (T, B, F)
    e = _pack_gru_linear(emb_p)
    r = _pack_gru_linear(rec_p)

    def full_spec(a):   # whole (small) parameter array resident each step
        return pl.BlockSpec(a.shape, lambda i: (0,) * a.ndim)

    out_tm = pl.pallas_call(
        _autoencoder_kernel,
        grid=(B // batch_block,),
        out_shape=jax.ShapeDtypeStruct((T, B, feat), jnp.float32),
        in_specs=[pl.BlockSpec((T, batch_block, F), lambda i: (0, i, 0))]
                 + [full_spec(a) for a in (*e, *r)],
        out_specs=pl.BlockSpec((T, batch_block, feat), lambda i: (0, i, 0)),
        compiler_params=pltpu.CompilerParams(
            dimension_semantics=("parallel",)),              # v7x: 2 TCs
    )(x_tm, *e, *r)

    return jnp.transpose(out_tm, (1, 0, 2))                  # (B, T, F)


# ----------------------------------------------------------------------------
# Parameter init (deterministic, PyTorch-style uniform(-1/sqrt(H), 1/sqrt(H)))
# Stored per-gate (leading axis of 3, order [r, z, n]), already transposed so
# the math is x @ W; the wrapper fuses/folds them for the kernel.
# ----------------------------------------------------------------------------
def init_gru_linear_params(key, in_dim, hidden, out_dim):
    ks = jax.random.split(key, 6)
    bound = 1.0 / jnp.sqrt(jnp.float32(hidden))

    def u(k, shape):
        return jax.random.uniform(k, shape, jnp.float32, -bound, bound)

    return {
        "w_ih": u(ks[0], (3, in_dim, hidden)),
        "w_hh": u(ks[1], (3, hidden, hidden)),
        "b_ih": u(ks[2], (3, 1, hidden)),
        "b_hh": u(ks[3], (3, 1, hidden)),
        "w_fc": u(ks[4], (hidden, out_dim)),
        "b_fc": u(ks[5], (1, out_dim)),
    }


# ----------------------------------------------------------------------------
# Pure-JAX f32 reference (exact module semantics, for correctness check)
# ----------------------------------------------------------------------------
def _gru_linear_ref(x_tm, p, hidden):
    T, B, _ = x_tm.shape

    def cell(h, x_t):
        gi_r = x_t @ p["w_ih"][0] + p["b_ih"][0]
        gi_z = x_t @ p["w_ih"][1] + p["b_ih"][1]
        gi_n = x_t @ p["w_ih"][2] + p["b_ih"][2]
        gh_r = h @ p["w_hh"][0] + p["b_hh"][0]
        gh_z = h @ p["w_hh"][1] + p["b_hh"][1]
        gh_n = h @ p["w_hh"][2] + p["b_hh"][2]
        r = jax.nn.sigmoid(gi_r + gh_r)
        z = jax.nn.sigmoid(gi_z + gh_z)
        n = jnp.tanh(gi_n + r * gh_n)
        h_new = (1.0 - z) * n + z * h
        y = jax.nn.sigmoid(h_new @ p["w_fc"] + p["b_fc"])
        return h_new, y

    _, ys = lax.scan(cell, jnp.zeros((B, hidden), jnp.float32), x_tm)
    return ys


def autoencoder_ref(x_bt, emb_p, rec_p, hidden):
    x_tm = jnp.transpose(x_bt, (1, 0, 2))
    h_tm = _gru_linear_ref(x_tm, emb_p, hidden)
    xt_tm = _gru_linear_ref(h_tm, rec_p, hidden)
    return jnp.transpose(xt_tm, (1, 0, 2))


if __name__ == "__main__":
    # B = 2 x 8-row blocks -> exercises the "parallel" grid; B_blk multiple of 8
    # keeps all (T,B,*) <-> (T*B,*) reshapes layout-free.
    B, T, FEAT, HIDDEN = 16, 8, 4, 32

    key = jax.random.PRNGKey(0)
    k_x, k_emb, k_rec = jax.random.split(key, 3)

    x = jax.random.uniform(k_x, (B, T, FEAT), jnp.float32)
    emb_params = init_gru_linear_params(k_emb, FEAT, HIDDEN, HIDDEN)
    rec_params = init_gru_linear_params(k_rec, HIDDEN, HIDDEN, FEAT)

    fwd = jax.jit(functools.partial(autoencoder_pallas, hidden=HIDDEN, feat=FEAT))
    x_tilde = jax.block_until_ready(fwd(x, emb_params, rec_params))

    ref = autoencoder_ref(x, emb_params, rec_params, HIDDEN)
    assert x_tilde.shape == (B, T, FEAT)
    # bf16 matmul operands (f32 accumulate) vs. the exact-f32 reference ->
    # relaxed tolerance (expected per perf review).
    assert jnp.allclose(x_tilde, ref, atol=5e-2, rtol=5e-2), (
        float(jnp.max(jnp.abs(x_tilde - ref))))

    print("KERNEL_OK")
</pallas_src>

<mosaic_0001>
module attributes {stable_mosaic.version = 11 : i64} {
  func.func @_autoencoder_kernel(%arg0: i32, %arg1: memref<8x8x4xf32, #tpu.memory_space<vmem>>, %arg2: memref<4x96xbf16, #tpu.memory_space<vmem>>, %arg3: memref<32x96xbf16, #tpu.memory_space<vmem>>, %arg4: memref<1x96xf32, #tpu.memory_space<vmem>>, %arg5: memref<1x32xf32, #tpu.memory_space<vmem>>, %arg6: memref<32x32xbf16, #tpu.memory_space<vmem>>, %arg7: memref<1x32xf32, #tpu.memory_space<vmem>>, %arg8: memref<32x96xbf16, #tpu.memory_space<vmem>>, %arg9: memref<32x96xbf16, #tpu.memory_space<vmem>>, %arg10: memref<1x96xf32, #tpu.memory_space<vmem>>, %arg11: memref<1x32xf32, #tpu.memory_space<vmem>>, %arg12: memref<32x4xbf16, #tpu.memory_space<vmem>>, %arg13: memref<1x4xf32, #tpu.memory_space<vmem>>, %arg14: memref<8x8x4xf32, #tpu.memory_space<vmem>>) attributes {dimension_semantics = [#tpu.dimension_semantics<parallel>], iteration_bounds = array<i64: 2>, scalar_prefetch = 0 : i64, scratch_operands = 0 : i64, tpu.core_type = #tpu.core_type<tc>, window_params = [{transform_indices = @transform_0, window_bounds = array<i64: 8, 8, 4>}, {pipeline_mode = #tpu.pipeline_mode<synchronous>, transform_indices = @transform_1, window_bounds = array<i64: 4, 96>}, {pipeline_mode = #tpu.pipeline_mode<synchronous>, transform_indices = @transform_2, window_bounds = array<i64: 32, 96>}, {pipeline_mode = #tpu.pipeline_mode<synchronous>, transform_indices = @transform_3, window_bounds = array<i64: 1, 96>}, {pipeline_mode = #tpu.pipeline_mode<synchronous>, transform_indices = @transform_4, window_bounds = array<i64: 1, 32>}, {pipeline_mode = #tpu.pipeline_mode<synchronous>, transform_indices = @transform_5, window_bounds = array<i64: 32, 32>}, {pipeline_mode = #tpu.pipeline_mode<synchronous>, transform_indices = @transform_6, window_bounds = array<i64: 1, 32>}, {pipeline_mode = #tpu.pipeline_mode<synchronous>, transform_indices = @transform_7, window_bounds = array<i64: 32, 96>}, {pipeline_mode = #tpu.pipeline_mode<synchronous>, transform_indices = @transform_8, window_bounds = array<i64: 32, 96>}, {pipeline_mode = #tpu.pipeline_mode<synchronous>, transform_indices = @transform_9, window_bounds = array<i64: 1, 96>}, {pipeline_mode = #tpu.pipeline_mode<synchronous>, transform_indices = @transform_10, window_bounds = array<i64: 1, 32>}, {pipeline_mode = #tpu.pipeline_mode<synchronous>, transform_indices = @transform_11, window_bounds = array<i64: 32, 4>}, {pipeline_mode = #tpu.pipeline_mode<synchronous>, transform_indices = @transform_12, window_bounds = array<i64: 1, 4>}, {transform_indices = @transform_13, window_bounds = array<i64: 8, 8, 4>}]} {
    %c0 = arith.constant 0 : index
    %c0_0 = arith.constant 0 : index
    %c0_1 = arith.constant 0 : index
    %0 = vector.load %arg1[%c0, %c0_0, %c0_1] : memref<8x8x4xf32, #tpu.memory_space<vmem>>, vector<8x8x4xf32>
    %1 = vector.shape_cast %0 : vector<8x8x4xf32> to vector<64x4xf32>
    %2 = arith.truncf %1 : vector<64x4xf32> to vector<64x4xbf16>
    %c0_2 = arith.constant 0 : index
    %c0_3 = arith.constant 0 : index
    %3 = vector.load %arg2[%c0_2, %c0_3] : memref<4x96xbf16, #tpu.memory_space<vmem>>, vector<4x96xbf16>
    %cst = arith.constant dense<0.000000e+00> : vector<64x96xf32>
    %4 = tpu.matmul %2, %3, %cst {dimension_numbers = #tpu.dot_dimension_numbers<[1], [0], [0], [1], [0, 0, 1, 1], [], []>} : vector<64x4xbf16>, vector<4x96xbf16>, vector<64x96xf32> -> vector<64x96xf32>
    %c0_4 = arith.constant 0 : index
    %c0_5 = arith.constant 0 : index
    %5 = vector.load %arg4[%c0_4, %c0_5] : memref<1x96xf32, #tpu.memory_space<vmem>>, vector<1x96xf32>
    %6 = vector.broadcast %5 : vector<1x96xf32> to vector<64x96xf32>
    %7 = arith.addf %4, %6 : vector<64x96xf32>
    %c0_6 = arith.constant 0 : index
    %c0_7 = arith.constant 0 : index
    %8 = vector.load %arg3[%c0_6, %c0_7] : memref<32x96xbf16, #tpu.memory_space<vmem>>, vector<32x96xbf16>
    %c0_8 = arith.constant 0 : index
    %c0_9 = arith.constant 0 : index
    %9 = vector.load %arg5[%c0_8, %c0_9] : memref<1x32xf32, #tpu.memory_space<vmem>>, vector<1x32xf32>
    %cst_10 = arith.constant 0.000000e+00 : f32
    %10 = vector.broadcast %cst_10 : f32 to vector<8x32xf32>
    %11 = vector.extract_strided_slice %7 {offsets = [0, 0], sizes = [8, 96], strides = [1, 1]} : vector<64x96xf32> to vector<8x96xf32>
    %12 = arith.truncf %10 : vector<8x32xf32> to vector<8x32xbf16>
    %cst_11 = arith.constant dense<0.000000e+00> : vector<8x96xf32>
    %13 = tpu.matmul %12, %8, %cst_11 {dimension_numbers = #tpu.dot_dimension_numbers<[1], [0], [0], [1], [0, 0, 1, 1], [], []>} : vector<8x32xbf16>, vector<32x96xbf16>, vector<8x96xf32> -> vector<8x96xf32>
    %14 = vector.extract_strided_slice %11 {offsets = [0, 0], sizes = [8, 32], strides = [1, 1]} : vector<8x96xf32> to vector<8x32xf32>
    %15 = vector.extract_strided_slice %13 {offsets = [0, 0], sizes = [8, 32], strides = [1, 1]} : vector<8x96xf32> to vector<8x32xf32>
    %16 = arith.addf %14, %15 : vector<8x32xf32>
    %17 = arith.negf %16 : vector<8x32xf32>
    %18 = math.exp %17 : vector<8x32xf32>
    %cst_12 = arith.constant 1.000000e+00 : f32
    %19 = vector.broadcast %cst_12 : f32 to vector<8x32xf32>
    %20 = arith.addf %19, %18 : vector<8x32xf32>
    %21 = arith.divf %19, %20 : vector<8x32xf32>
    %22 = vector.extract_strided_slice %11 {offsets = [0, 32], sizes = [8, 32], strides = [1, 1]} : vector<8x96xf32> to vector<8x32xf32>
    %23 = vector.extract_strided_slice %13 {offsets = [0, 32], sizes = [8, 32], strides = [1, 1]} : vector<8x96xf32> to vector<8x32xf32>
    %24 = arith.addf %22, %23 : vector<8x32xf32>
    %25 = arith.negf %24 : vector<8x32xf32>
    %26 = math.exp %25 : vector<8x32xf32>
    %cst_13 = arith.constant 1.000000e+00 : f32
    %27 = vector.broadcast %cst_13 : f32 to vector<8x32xf32>
    %28 = arith.addf %27, %26 : vector<8x32xf32>
    %29 = arith.divf %27, %28 : vector<8x32xf32>
    %30 = vector.extract_strided_slice %11 {offsets = [0, 64], sizes = [8, 32], strides = [1, 1]} : vector<8x96xf32> to vector<8x32xf32>
    %31 = vector.extract_strided_slice %13 {offsets = [0, 64], sizes = [8, 32], strides = [1, 1]} : vector<8x96xf32> to vector<8x32xf32>
    %32 = vector.broadcast %9 : vector<1x32xf32> to vector<8x32xf32>
    %33 = arith.addf %31, %32 : vector<8x32xf32>
    %34 = arith.mulf %21, %33 : vector<8x32xf32>
    %35 = arith.addf %30, %34 : vector<8x32xf32>
    %36 = math.tanh %35 : vector<8x32xf32>
    %cst_14 = arith.constant 1.000000e+00 : f32
    %37 = vector.broadcast %cst_14 : f32 to vector<8x32xf32>
    %38 = arith.subf %37, %29 : vector<8x32xf32>
    %39 = arith.mulf %38, %36 : vector<8x32xf32>
    %40 = arith.mulf %29, %10 : vector<8x32xf32>
    %41 = arith.addf %39, %40 : vector<8x32xf32>
    %42 = vector.extract_strided_slice %7 {offsets = [8, 0], sizes = [8, 96], strides = [1, 1]} : vector<64x96xf32> to vector<8x96xf32>
    %43 = arith.truncf %41 : vector<8x32xf32> to vector<8x32xbf16>
    %cst_15 = arith.constant dense<0.000000e+00> : vector<8x96xf32>
    %44 = tpu.matmul %43, %8, %cst_15 {dimension_numbers = #tpu.dot_dimension_numbers<[1], [0], [0], [1], [0, 0, 1, 1], [], []>} : vector<8x32xbf16>, vector<32x96xbf16>, vector<8x96xf32> -> vector<8x96xf32>
    %45 = vector.extract_strided_slice %42 {offsets = [0, 0], sizes = [8, 32], strides = [1, 1]} : vector<8x96xf32> to vector<8x32xf32>
    %46 = vector.extract_strided_slice %44 {offsets = [0, 0], sizes = [8, 32], strides = [1, 1]} : vector<8x96xf32> to vector<8x32xf32>
    %47 = arith.addf %45, %46 : vector<8x32xf32>
    %48 = arith.negf %47 : vector<8x32xf32>
    %49 = math.exp %48 : vector<8x32xf32>
    %cst_16 = arith.constant 1.000000e+00 : f32
    %50 = vector.broadcast %cst_16 : f32 to vector<8x32xf32>
    %51 = arith.addf %50, %49 : vector<8x32xf32>
    %52 = arith.divf %50, %51 : vector<8x32xf32>
    %53 = vector.extract_strided_slice %42 {offsets = [0, 32], sizes = [8, 32], strides = [1, 1]} : vector<8x96xf32> to vector<8x32xf32>
    %54 = vector.extract_strided_slice %44 {offsets = [0, 32], sizes = [8, 32], strides = [1, 1]} : vector<8x96xf32> to vector<8x32xf32>
    %55 = arith.addf %53, %54 : vector<8x32xf32>
    %56 = arith.negf %55 : vector<8x32xf32>
    %57 = math.exp %56 : vector<8x32xf32>
    %cst_17 = arith.constant 1.000000e+00 : f32
    %58 = vector.broadcast %cst_17 : f32 to vector<8x32xf32>
    %59 = arith.addf %58, %57 : vector<8x32xf32>
    %60 = arith.divf %58, %59 : vector<8x32xf32>
    %61 = vector.extract_strided_slice %42 {offsets = [0, 64], sizes = [8, 32], strides = [1, 1]} : vector<8x96xf32> to vector<8x32xf32>
    %62 = vector.extract_strided_slice %44 {offsets = [0, 64], sizes = [8, 32], strides = [1, 1]} : vector<8x96xf32> to vector<8x32xf32>
    %63 = vector.broadcast %9 : vector<1x32xf32> to vector<8x32xf32>
    %64 = arith.addf %62, %63 : vector<8x32xf32>
    %65 = arith.mulf %52, %64 : vector<8x32xf32>
    %66 = arith.addf %61, %65 : vector<8x32xf32>
    %67 = math.tanh %66 : vector<8x32xf32>
    %cst_18 = arith.constant 1.000000e+00 : f32
    %68 = vector.broadcast %cst_18 : f32 to vector<8x32xf32>
    %69 = arith.subf %68, %60 : vector<8x32xf32>
    %70 = arith.mulf %69, %67 : vector<8x32xf32>
    %71 = arith.mulf %60, %41 : vector<8x32xf32>
    %72 = arith.addf %70, %71 : vector<8x32xf32>
    %73 = vector.extract_strided_slice %7 {offsets = [16, 0], sizes = [8, 96], strides = [1, 1]} : vector<64x96xf32> to vector<8x96xf32>
    %74 = arith.truncf %72 : vector<8x32xf32> to vector<8x32xbf16>
    %cst_19 = arith.constant dense<0.000000e+00> : vector<8x96xf32>
    %75 = tpu.matmul %74, %8, %cst_19 {dimension_numbers = #tpu.dot_dimension_numbers<[1], [0], [0], [1], [0, 0, 1, 1], [], []>} : vector<8x32xbf16>, vector<32x96xbf16>, vector<8x96xf32> -> vector<8x96xf32>
    %76 = vector.extract_strided_slice %73 {offsets = [0, 0], sizes = [8, 32], strides = [1, 1]} : vector<8x96xf32> to vector<8x32xf32>
    %77 = vector.extract_strided_slice %75 {offsets = [0, 0], sizes = [8, 32], strides = [1, 1]} : vector<8x96xf32> to vector<8x32xf32>
    %78 = arith.addf %76, %77 : vector<8x32xf32>
    %79 = arith.negf %78 : vector<8x32xf32>
    %80 = math.exp %79 : vector<8x32xf32>
    %cst_20 = arith.constant 1.000000e+00 : f32
    %81 = vector.broadcast %cst_20 : f32 to vector<8x32xf32>
    %82 = arith.addf %81, %80 : vector<8x32xf32>
    %83 = arith.divf %81, %82 : vector<8x32xf32>
    %84 = vector.extract_strided_slice %73 {offsets = [0, 32], sizes = [8, 32], strides = [1, 1]} : vector<8x96xf32> to vector<8x32xf32>
    %85 = vector.extract_strided_slice %75 {offsets = [0, 32], sizes = [8, 32], strides = [1, 1]} : vector<8x96xf32> to vector<8x32xf32>
    %86 = arith.addf %84, %85 : vector<8x32xf32>
    %87 = arith.negf %86 : vector<8x32xf32>
    %88 = math.exp %87 : vector<8x32xf32>
    %cst_21 = arith.constant 1.000000e+00 : f32
    %89 = vector.broadcast %cst_21 : f32 to vector<8x32xf32>
    %90 = arith.addf %89, %88 : vector<8x32xf32>
    %91 = arith.divf %89, %90 : vector<8x32xf32>
    %92 = vector.extract_strided_slice %73 {offsets = [0, 64], sizes = [8, 32], strides = [1, 1]} : vector<8x96xf32> to vector<8x32xf32>
    %93 = vector.extract_strided_slice %75 {offsets = [0, 64], sizes = [8, 32], strides = [1, 1]} : vector<8x96xf32> to vector<8x32xf32>
    %94 = vector.broadcast %9 : vector<1x32xf32> to vector<8x32xf32>
    %95 = arith.addf %93, %94 : vector<8x32xf32>
    %96 = arith.mulf %83, %95 : vector<8x32xf32>
    %97 = arith.addf %92, %96 : vector<8x32xf32>
    %98 = math.tanh %97 : vector<8x32xf32>
    %cst_22 = arith.constant 1.000000e+00 : f32
    %99 = vector.broadcast %cst_22 : f32 to vector<8x32xf32>
    %100 = arith.subf %99, %91 : vector<8x32xf32>
    %101 = arith.mulf %100, %98 : vector<8x32xf32>
    %102 = arith.mulf %91, %72 : vector<8x32xf32>
    %103 = arith.addf %101, %102 : vector<8x32xf32>
    %104 = vector.extract_strided_slice %7 {offsets = [24, 0], sizes = [8, 96], strides = [1, 1]} : vector<64x96xf32> to vector<8x96xf32>
    %105 = arith.truncf %103 : vector<8x32xf32> to vector<8x32xbf16>
    %cst_23 = arith.constant dense<0.000000e+00> : vector<8x96xf32>
    %106 = tpu.matmul %105, %8, %cst_23 {dimension_numbers = #tpu.dot_dimension_numbers<[1], [0], [0], [1], [0, 0, 1, 1], [], []>} : vector<8x32xbf16>, vector<32x96xbf16>, vector<8x96xf32> -> vector<8x96xf32>
    %107 = vector.extract_strided_slice %104 {offsets = [0, 0], sizes = [8, 32], strides = [1, 1]} : vector<8x96xf32> to vector<8x32xf32>
    %108 = vector.extract_strided_slice %106 {offsets = [0, 0], sizes = [8, 32], strides = [1, 1]} : vector<8x96xf32> to vector<8x32xf32>
    %109 = arith.addf %107, %108 : vector<8x32xf32>
    %110 = arith.negf %109 : vector<8x32xf32>
    %111 = math.exp %110 : vector<8x32xf32>
    %cst_24 = arith.constant 1.000000e+00 : f32
    %112 = vector.broadcast %cst_24 : f32 to vector<8x32xf32>
    %113 = arith.addf %112, %111 : vector<8x32xf32>
    %114 = arith.divf %112, %113 : vector<8x32xf32>
    %115 = vector.extract_strided_slice %104 {offsets = [0, 32], sizes = [8, 32], strides = [1, 1]} : vector<8x96xf32> to vector<8x32xf32>
    %116 = vector.extract_strided_slice %106 {offsets = [0, 32], sizes = [8, 32], strides = [1, 1]} : vector<8x96xf32> to vector<8x32xf32>
    %117 = arith.addf %115, %116 : vector<8x32xf32>
    %118 = arith.negf %117 : vector<8x32xf32>
    %119 = math.exp %118 : vector<8x32xf32>
    %cst_25 = arith.constant 1.000000e+00 : f32
    %120 = vector.broadcast %cst_25 : f32 to vector<8x32xf32>
    %121 = arith.addf %120, %119 : vector<8x32xf32>
    %122 = arith.divf %120, %121 : vector<8x32xf32>
    %123 = vector.extract_strided_slice %104 {offsets = [0, 64], sizes = [8, 32], strides = [1, 1]} : vector<8x96xf32> to vector<8x32xf32>
    %124 = vector.extract_strided_slice %106 {offsets = [0, 64], sizes = [8, 32], strides = [1, 1]} : vector<8x96xf32> to vector<8x32xf32>
    %125 = vector.broadcast %9 : vector<1x32xf32> to vector<8x32xf32>
    %126 = arith.addf %124, %125 : vector<8x32xf32>
    %127 = arith.mulf %114, %126 : vector<8x32xf32>
    %128 = arith.addf %123, %127 : vector<8x32xf32>
    %129 = math.tanh %128 : vector<8x32xf32>
    %cst_26 = arith.constant 1.000000e+00 : f32
    %130 = vector.broadcast %cst_26 : f32 to vector<8x32xf32>
    %131 = arith.subf %130, %122 : vector<8x32xf32>
    %132 = arith.mulf %131, %129 : vector<8x32xf32>
    %133 = arith.mulf %122, %103 : vector<8x32xf32>
    %134 = arith.addf %132, %133 : vector<8x32xf32>
    %135 = vector.extract_strided_slice %7 {offsets = [32, 0], sizes = [8, 96], strides = [1, 1]} : vector<64x96xf32> to vector<8x96xf32>
    %136 = arith.truncf %134 : vector<8x32xf32> to vector<8x32xbf16>
    %cst_27 = arith.constant dense<0.000000e+00> : vector<8x96xf32>
    %137 = tpu.matmul %136, %8, %cst_27 {dimension_numbers = #tpu.dot_dimension_numbers<[1], [0], [0], [1], [0, 0, 1, 1], [], []>} : vector<8x32xbf16>, vector<32x96xbf16>, vector<8x96xf32> -> vector<8x96xf32>
    %138 = vector.extract_strided_slice %135 {offsets = [0, 0], sizes = [8, 32], strides = [1, 1]} : vector<8x96xf32> to vector<8x32xf32>
    %139 = vector.extract_strided_slice %137 {offsets = [0, 0], sizes = [8, 32], strides = [1, 1]} : vector<8x96xf32> to vector<8x32xf32>
    %140 = arith.addf %138, %139 : vector<8x32xf32>
    %141 = arith.negf %140 : vector<8x32xf32>
    %142 = math.exp %141 : vector<8x32xf32>
    %cst_28 = arith.constant 1.000000e+00 : f32
    %143 = vector.broadcast %cst_28 : f32 to vector<8x32xf32>
    %144 = arith.addf %143, %142 : vector<8x32xf32>
    %145 = arith.divf %143, %144 : vector<8x32xf32>
    %146 = vector.extract_strided_slice %135 {offsets = [0, 32], sizes = [8, 32], strides = [1, 1]} : vector<8x96xf32> to vector<8x32xf32>
    %147 = vector.extract_strided_slice %137 {offsets = [0, 32], sizes = [8, 32], strides = [1, 1]} : vector<8x96xf32> to vector<8x32xf32>
    %148 = arith.addf %146, %147 : vector<8x32xf32>
    %149 = arith.negf %148 : vector<8x32xf32>
    %150 = math.exp %149 : vector<8x32xf32>
    %cst_29 = arith.constant 1.000000e+00 : f32
    %151 = vector.broadcast %cst_29 : f32 to vector<8x32xf32>
    %152 = arith.addf %151, %150 : vector<8x32xf32>
    %153 = arith.divf %151, %152 : vector<8x32xf32>
    %154 = vector.extract_strided_slice %135 {offsets = [0, 64], sizes = [8, 32], strides = [1, 1]} : vector<8x96xf32> to vector<8x32xf32>
    %155 = vector.extract_strided_slice %137 {offsets = [0, 64], sizes = [8, 32], strides = [1, 1]} : vector<8x96xf32> to vector<8x32xf32>
    %156 = vector.broadcast %9 : vector<1x32xf32> to vector<8x32xf32>
    %157 = arith.addf %155, %156 : vector<8x32xf32>
    %158 = arith.mulf %145, %157 : vector<8x32xf32>
    %159 = arith.addf %154, %158 : vector<8x32xf32>
    %160 = math.tanh %159 : vector<8x32xf32>
    %cst_30 = arith.constant 1.000000e+00 : f32
    %161 = vector.broadcast %cst_30 : f32 to vector<8x32xf32>
    %162 = arith.subf %161, %153 : vector<8x32xf32>
    %163 = arith.mulf %162, %160 : vector<8x32xf32>
    %164 = arith.mulf %153, %134 : vector<8x32xf32>
    %165 = arith.addf %163, %164 : vector<8x32xf32>
    %166 = vector.extract_strided_slice %7 {offsets = [40, 0], sizes = [8, 96], strides = [1, 1]} : vector<64x96xf32> to vector<8x96xf32>
    %167 = arith.truncf %165 : vector<8x32xf32> to vector<8x32xbf16>
    %cst_31 = arith.constant dense<0.000000e+00> : vector<8x96xf32>
    %168 = tpu.matmul %167, %8, %cst_31 {dimension_numbers = #tpu.dot_dimension_numbers<[1], [0], [0], [1], [0, 0, 1, 1], [], []>} : vector<8x32xbf16>, vector<32x96xbf16>, vector<8x96xf32> -> vector<8x96xf32>
    %169 = vector.extract_strided_slice %166 {offsets = [0, 0], sizes = [8, 32], strides = [1, 1]} : vector<8x96xf32> to vector<8x32xf32>
    %170 = vector.extract_strided_slice %168 {offsets = [0, 0], sizes = [8, 32], strides = [1, 1]} : vector<8x96xf32> to vector<8x32xf32>
    %171 = arith.addf %169, %170 : vector<8x32xf32>
    %172 = arith.negf %171 : vector<8x32xf32>
    %173 = math.exp %172 : vector<8x32xf32>
    %cst_32 = arith.constant 1.000000e+00 : f32
    %174 = vector.broadcast %cst_32 : f32 to vector<8x32xf32>
    %175 = arith.addf %174, %173 : vector<8x32xf32>
    %176 = arith.divf %174, %175 : vector<8x32xf32>
    %177 = vector.extract_strided_slice %166 {offsets = [0, 32], sizes = [8, 32], strides = [1, 1]} : vector<8x96xf32> to vector<8x32xf32>
    %178 = vector.extract_strided_slice %168 {offsets = [0, 32], sizes = [8, 32], strides = [1, 1]} : vector<8x96xf32> to vector<8x32xf32>
    %179 = arith.addf %177, %178 : vector<8x32xf32>
    %180 = arith.negf %179 : vector<8x32xf32>
    %181 = math.exp %180 : vector<8x32xf32>
    %cst_33 = arith.constant 1.000000e+00 : f32
    %182 = vector.broadcast %cst_33 : f32 to vector<8x32xf32>
    %183 = arith.addf %182, %181 : vector<8x32xf32>
    %184 = arith.divf %182, %183 : vector<8x32xf32>
    %185 = vector.extract_strided_slice %166 {offsets = [0, 64], sizes = [8, 32], strides = [1, 1]} : vector<8x96xf32> to vector<8x32xf32>
    %186 = vector.extract_strided_slice %168 {offsets = [0, 64], sizes = [8, 32], strides = [1, 1]} : vector<8x96xf32> to vector<8x32xf32>
    %187 = vector.broadcast %9 : vector<1x32xf32> to vector<8x32xf32>
    %188 = arith.addf %186, %187 : vector<8x32xf32>
    %189 = arith.mulf %176, %188 : vector<8x32xf32>
    %190 = arith.addf %185, %189 : vector<8x32xf32>
    %191 = math.tanh %190 : vector<8x32xf32>
    %cst_34 = arith.constant 1.000000e+00 : f32
    %192 = vector.broadcast %cst_34 : f32 to vector<8x32xf32>
    %193 = arith.subf %192, %184 : vector<8x32xf32>
    %194 = arith.mulf %193, %191 : vector<8x32xf32>
    %195 = arith.mulf %184, %165 : vector<8x32xf32>
    %196 = arith.addf %194, %195 : vector<8x32xf32>
    %197 = vector.extract_strided_slice %7 {offsets = [48, 0], sizes = [8, 96], strides = [1, 1]} : vector<64x96xf32> to vector<8x96xf32>
    %198 = arith.truncf %196 : vector<8x32xf32> to vector<8x32xbf16>
    %cst_35 = arith.constant dense<0.000000e+00> : vector<8x96xf32>
    %199 = tpu.matmul %198, %8, %cst_35 {dimension_numbers = #tpu.dot_dimension_numbers<[1], [0], [0], [1], [0, 0, 1, 1], [], []>} : vector<8x32xbf16>, vector<32x96xbf16>, vector<8x96xf32> -> vector<8x96xf32>
    %200 = vector.extract_strided_slice %197 {offsets = [0, 0], sizes = [8, 32], strides = [1, 1]} : vector<8x96xf32> to vector<8x32xf32>
    %201 = vector.extract_strided_slice %199 {offsets = [0, 0], sizes = [8, 32], strides = [1, 1]} : vector<8x96xf32> to vector<8x32xf32>
    %202 = arith.addf %200, %201 : vector<8x32xf32>
    %203 = arith.negf %202 : vector<8x32xf32>
    %204 = math.exp %203 : vector<8x32xf32>
    %cst_36 = arith.constant 1.000000e+00 : f32
    %205 = vector.broadcast %cst_36 : f32 to vector<8x32xf32>
    %206 = arith.addf %205, %204 : vector<8x32xf32>
    %207 = arith.divf %205, %206 : vector<8x32xf32>
    %208 = vector.extract_strided_slice %197 {offsets = [0, 32], sizes = [8, 32], strides = [1, 1]} : vector<8x96xf32> to vector<8x32xf32>
    %209 = vector.extract_strided_slice %199 {offsets = [0, 32], sizes = [8, 32], strides = [1, 1]} : vector<8x96xf32> to vector<8x32xf32>
    %210 = arith.addf %208, %209 : vector<8x32xf32>
    %211 = arith.negf %210 : vector<8x32xf32>
    %212 = math.exp %211 : vector<8x32xf32>
    %cst_37 = arith.constant 1.000000e+00 : f32
    %213 = vector.broadcast %cst_37 : f32 to vector<8x32xf32>
    %214 = arith.addf %213, %212 : vector<8x32xf32>
    %215 = arith.divf %213, %214 : vector<8x32xf32>
    %216 = vector.extract_strided_slice %197 {offsets = [0, 64], sizes = [8, 32], strides = [1, 1]} : vector<8x96xf32> to vector<8x32xf32>
    %217 = vector.extract_strided_slice %199 {offsets = [0, 64], sizes = [8, 32], strides = [1, 1]} : vector<8x96xf32> to vector<8x32xf32>
    %218 = vector.broadcast %9 : vector<1x32xf32> to vector<8x32xf32>
    %219 = arith.addf %217, %218 : vector<8x32xf32>
    %220 = arith.mulf %207, %219 : vector<8x32xf32>
    %221 = arith.addf %216, %220 : vector<8x32xf32>
    %222 = math.tanh %221 : vector<8x32xf32>
    %cst_38 = arith.constant 1.000000e+00 : f32
    %223 = vector.broadcast %cst_38 : f32 to vector<8x32xf32>
    %224 = arith.subf %223, %215 : vector<8x32xf32>
    %225 = arith.mulf %224, %222 : vector<8x32xf32>
    %226 = arith.mulf %215, %196 : vector<8x32xf32>
    %227 = arith.addf %225, %226 : vector<8x32xf32>
    %228 = vector.extract_strided_slice %7 {offsets = [56, 0], sizes = [8, 96], strides = [1, 1]} : vector<64x96xf32> to vector<8x96xf32>
    %229 = arith.truncf %227 : vector<8x32xf32> to vector<8x32xbf16>
    %cst_39 = arith.constant dense<0.000000e+00> : vector<8x96xf32>
    %230 = tpu.matmul %229, %8, %cst_39 {dimension_numbers = #tpu.dot_dimension_numbers<[1], [0], [0], [1], [0, 0, 1, 1], [], []>} : vector<8x32xbf16>, vector<32x96xbf16>, vector<8x96xf32> -> vector<8x96xf32>
    %231 = vector.extract_strided_slice %228 {offsets = [0, 0], sizes = [8, 32], strides = [1, 1]} : vector<8x96xf32> to vector<8x32xf32>
    %232 = vector.extract_strided_slice %230 {offsets = [0, 0], sizes = [8, 32], strides = [1, 1]} : vector<8x96xf32> to vector<8x32xf32>
    %233 = arith.addf %231, %232 : vector<8x32xf32>
    %234 = arith.negf %233 : vector<8x32xf32>
    %235 = math.exp %234 : vector<8x32xf32>
    %cst_40 = arith.constant 1.000000e+00 : f32
    %236 = vector.broadcast %cst_40 : f32 to vector<8x32xf32>
    %237 = arith.addf %236, %235 : vector<8x32xf32>
    %238 = arith.divf %236, %237 : vector<8x32xf32>
    %239 = vector.extract_strided_slice %228 {offsets = [0, 32], sizes = [8, 32], strides = [1, 1]} : vector<8x96xf32> to vector<8x32xf32>
    %240 = vector.extract_strided_slice %230 {offsets = [0, 32], sizes = [8, 32], strides = [1, 1]} : vector<8x96xf32> to vector<8x32xf32>
    %241 = arith.addf %239, %240 : vector<8x32xf32>
    %242 = arith.negf %241 : vector<8x32xf32>
    %243 = math.exp %242 : vector<8x32xf32>
    %cst_41 = arith.constant 1.000000e+00 : f32
    %244 = vector.broadcast %cst_41 : f32 to vector<8x32xf32>
    %245 = arith.addf %244, %243 : vector<8x32xf32>
    %246 = arith.divf %244, %245 : vector<8x32xf32>
    %247 = vector.extract_strided_slice %228 {offsets = [0, 64], sizes = [8, 32], strides = [1, 1]} : vector<8x96xf32> to vector<8x32xf32>
    %248 = vector.extract_strided_slice %230 {offsets = [0, 64], sizes = [8, 32], strides = [1, 1]} : vector<8x96xf32> to vector<8x32xf32>
    %249 = vector.broadcast %9 : vector<1x32xf32> to vector<8x32xf32>
    %250 = arith.addf %248, %249 : vector<8x32xf32>
    %251 = arith.mulf %238, %250 : vector<8x32xf32>
    %252 = arith.addf %247, %251 : vector<8x32xf32>
    %253 = math.tanh %252 : vector<8x32xf32>
    %cst_42 = arith.constant 1.000000e+00 : f32
    %254 = vector.broadcast %cst_42 : f32 to vector<8x32xf32>
    %255 = arith.subf %254, %246 : vector<8x32xf32>
    %256 = arith.mulf %255, %253 : vector<8x32xf32>
    %257 = arith.mulf %246, %227 : vector<8x32xf32>
    %258 = arith.addf %256, %257 : vector<8x32xf32>
    %259 = tpu.concatenate %41, %72, %103, %134, %165, %196, %227, %258 in 0 : vector<8x32xf32>, vector<8x32xf32>, vector<8x32xf32>, vector<8x32xf32>, vector<8x32xf32>, vector<8x32xf32>, vector<8x32xf32>, vector<8x32xf32> -> vector<64x32xf32>
    %260 = arith.truncf %259 : vector<64x32xf32> to vector<64x32xbf16>
    %c0_43 = arith.constant 0 : index
    %c0_44 = arith.constant 0 : index
    %261 = vector.load %arg6[%c0_43, %c0_44] : memref<32x32xbf16, #tpu.memory_space<vmem>>, vector<32x32xbf16>
    %cst_45 = arith.constant dense<0.000000e+00> : vector<64x32xf32>
    %262 = tpu.matmul %260, %261, %cst_45 {dimension_numbers = #tpu.dot_dimension_numbers<[1], [0], [0], [1], [0, 0, 1, 1], [], []>} : vector<64x32xbf16>, vector<32x32xbf16>, vector<64x32xf32> -> vector<64x32xf32>
    %c0_46 = arith.constant 0 : index
    %c0_47 = arith.constant 0 : index
    %263 = vector.load %arg7[%c0_46, %c0_47] : memref<1x32xf32, #tpu.memory_space<vmem>>, vector<1x32xf32>
    %264 = vector.broadcast %263 : vector<1x32xf32> to vector<64x32xf32>
    %265 = arith.addf %262, %264 : vector<64x32xf32>
    %266 = arith.negf %265 : vector<64x32xf32>
    %267 = math.exp %266 : vector<64x32xf32>
    %cst_48 = arith.constant 1.000000e+00 : f32
    %268 = vector.broadcast %cst_48 : f32 to vector<64x32xf32>
    %269 = arith.addf %268, %267 : vector<64x32xf32>
    %270 = arith.divf %268, %269 : vector<64x32xf32>
    %271 = arith.truncf %270 : vector<64x32xf32> to vector<64x32xbf16>
    %c0_49 = arith.constant 0 : index
    %c0_50 = arith.constant 0 : index
    %272 = vector.load %arg8[%c0_49, %c0_50] : memref<32x96xbf16, #tpu.memory_space<vmem>>, vector<32x96xbf16>
    %cst_51 = arith.constant dense<0.000000e+00> : vector<64x96xf32>
    %273 = tpu.matmul %271, %272, %cst_51 {dimension_numbers = #tpu.dot_dimension_numbers<[1], [0], [0], [1], [0, 0, 1, 1], [], []>} : vector<64x32xbf16>, vector<32x96xbf16>, vector<64x96xf32> -> vector<64x96xf32>
    %c0_52 = arith.constant 0 : index
    %c0_53 = arith.constant 0 : index
    %274 = vector.load %arg10[%c0_52, %c0_53] : memref<1x96xf32, #tpu.memory_space<vmem>>, vector<1x96xf32>
    %275 = vector.broadcast %274 : vector<1x96xf32> to vector<64x96xf32>
    %276 = arith.addf %273, %275 : vector<64x96xf32>
    %c0_54 = arith.constant 0 : index
    %c0_55 = arith.constant 0 : index
    %277 = vector.load %arg9[%c0_54, %c0_55] : memref<32x96xbf16, #tpu.memory_space<vmem>>, vector<32x96xbf16>
    %c0_56 = arith.constant 0 : index
    %c0_57 = arith.constant 0 : index
    %278 = vector.load %arg11[%c0_56, %c0_57] : memref<1x32xf32, #tpu.memory_space<vmem>>, vector<1x32xf32>
    %cst_58 = arith.constant 0.000000e+00 : f32
    %279 = vector.broadcast %cst_58 : f32 to vector<8x32xf32>
    %280 = vector.extract_strided_slice %276 {offsets = [0, 0], sizes = [8, 96], strides = [1, 1]} : vector<64x96xf32> to vector<8x96xf32>
    %281 = arith.truncf %279 : vector<8x32xf32> to vector<8x32xbf16>
    %cst_59 = arith.constant dense<0.000000e+00> : vector<8x96xf32>
    %282 = tpu.matmul %281, %277, %cst_59 {dimension_numbers = #tpu.dot_dimension_numbers<[1], [0], [0], [1], [0, 0, 1, 1], [], []>} : vector<8x32xbf16>, vector<32x96xbf16>, vector<8x96xf32> -> vector<8x96xf32>
    %283 = vector.extract_strided_slice %280 {offsets = [0, 0], sizes = [8, 32], strides = [1, 1]} : vector<8x96xf32> to vector<8x32xf32>
    %284 = vector.extract_strided_slice %282 {offsets = [0, 0], sizes = [8, 32], strides = [1, 1]} : vector<8x96xf32> to vector<8x32xf32>
    %285 = arith.addf %283, %284 : vector<8x32xf32>
    %286 = arith.negf %285 : vector<8x32xf32>
    %287 = math.exp %286 : vector<8x32xf32>
    %cst_60 = arith.constant 1.000000e+00 : f32
    %288 = vector.broadcast %cst_60 : f32 to vector<8x32xf32>
    %289 = arith.addf %288, %287 : vector<8x32xf32>
    %290 = arith.divf %288, %289 : vector<8x32xf32>
    %291 = vector.extract_strided_slice %280 {offsets = [0, 32], sizes = [8, 32], strides = [1, 1]} : vector<8x96xf32> to vector<8x32xf32>
    %292 = vector.extract_strided_slice %282 {offsets = [0, 32], sizes = [8, 32], strides = [1, 1]} : vector<8x96xf32> to vector<8x32xf32>
    %293 = arith.addf %291, %292 : vector<8x32xf32>
    %294 = arith.negf %293 : vector<8x32xf32>
    %295 = math.exp %294 : vector<8x32xf32>
    %cst_61 = arith.constant 1.000000e+00 : f32
    %296 = vector.broadcast %cst_61 : f32 to vector<8x32xf32>
    %297 = arith.addf %296, %295 : vector<8x32xf32>
    %298 = arith.divf %296, %297 : vector<8x32xf32>
    %299 = vector.extract_strided_slice %280 {offsets = [0, 64], sizes = [8, 32], strides = [1, 1]} : vector<8x96xf32> to vector<8x32xf32>
    %300 = vector.extract_strided_slice %282 {offsets = [0, 64], sizes = [8, 32], strides = [1, 1]} : vector<8x96xf32> to vector<8x32xf32>
    %301 = vector.broadcast %278 : vector<1x32xf32> to vector<8x32xf32>
    %302 = arith.addf %300, %301 : vector<8x32xf32>
    %303 = arith.mulf %290, %302 : vector<8x32xf32>
    %304 = arith.addf %299, %303 : vector<8x32xf32>
    %305 = math.tanh %304 : vector<8x32xf32>
    %cst_62 = arith.constant 1.000000e+00 : f32
    %306 = vector.broadcast %cst_62 : f32 to vector<8x32xf32>
    %307 = arith.subf %306, %298 : vector<8x32xf32>
    %308 = arith.mulf %307, %305 : vector<8x32xf32>
    %309 = arith.mulf %298, %279 : vector<8x32xf32>
    %310 = arith.addf %308, %309 : vector<8x32xf32>
    %311 = vector.extract_strided_slice %276 {offsets = [8, 0], sizes = [8, 96], strides = [1, 1]} : vector<64x96xf32> to vector<8x96xf32>
    %312 = arith.truncf %310 : vector<8x32xf32> to vector<8x32xbf16>
    %cst_63 = arith.constant dense<0.000000e+00> : vector<8x96xf32>
    %313 = tpu.matmul %312, %277, %cst_63 {dimension_numbers = #tpu.dot_dimension_numbers<[1], [0], [0], [1], [0, 0, 1, 1], [], []>} : vector<8x32xbf16>, vector<32x96xbf16>, vector<8x96xf32> -> vector<8x96xf32>
    %314 = vector.extract_strided_slice %311 {offsets = [0, 0], sizes = [8, 32], strides = [1, 1]} : vector<8x96xf32> to vector<8x32xf32>
    %315 = vector.extract_strided_slice %313 {offsets = [0, 0], sizes = [8, 32], strides = [1, 1]} : vector<8x96xf32> to vector<8x32xf32>
    %316 = arith.addf %314, %315 : vector<8x32xf32>
    %317 = arith.negf %316 : vector<8x32xf32>
    %318 = math.exp %317 : vector<8x32xf32>
    %cst_64 = arith.constant 1.000000e+00 : f32
    %319 = vector.broadcast %cst_64 : f32 to vector<8x32xf32>
    %320 = arith.addf %319, %318 : vector<8x32xf32>
    %321 = arith.divf %319, %320 : vector<8x32xf32>
    %322 = vector.extract_strided_slice %311 {offsets = [0, 32], sizes = [8, 32], strides = [1, 1]} : vector<8x96xf32> to vector<8x32xf32>
    %323 = vector.extract_strided_slice %313 {offsets = [0, 32], sizes = [8, 32], strides = [1, 1]} : vector<8x96xf32> to vector<8x32xf32>
    %324 = arith.addf %322, %323 : vector<8x32xf32>
    %325 = arith.negf %324 : vector<8x32xf32>
    %326 = math.exp %325 : vector<8x32xf32>
    %cst_65 = arith.constant 1.000000e+00 : f32
    %327 = vector.broadcast %cst_65 : f32 to vector<8x32xf32>
    %328 = arith.addf %327, %326 : vector<8x32xf32>
    %329 = arith.divf %327, %328 : vector<8x32xf32>
    %330 = vector.extract_strided_slice %311 {offsets = [0, 64], sizes = [8, 32], strides = [1, 1]} : vector<8x96xf32> to vector<8x32xf32>
    %331 = vector.extract_strided_slice %313 {offsets = [0, 64], sizes = [8, 32], strides = [1, 1]} : vector<8x96xf32> to vector<8x32xf32>
    %332 = vector.broadcast %278 : vector<1x32xf32> to vector<8x32xf32>
    %333 = arith.addf %331, %332 : vector<8x32xf32>
    %334 = arith.mulf %321, %333 : vector<8x32xf32>
    %335 = arith.addf %330, %334 : vector<8x32xf32>
    %336 = math.tanh %335 : vector<8x32xf32>
    %cst_66 = arith.constant 1.000000e+00 : f32
    %337 = vector.broadcast %cst_66 : f32 to vector<8x32xf32>
    %338 = arith.subf %337, %329 : vector<8x32xf32>
    %339 = arith.mulf %338, %336 : vector<8x32xf32>
    %340 = arith.mulf %329, %310 : vector<8x32xf32>
    %341 = arith.addf %339, %340 : vector<8x32xf32>
    %342 = vector.extract_strided_slice %276 {offsets = [16, 0], sizes = [8, 96], strides = [1, 1]} : vector<64x96xf32> to vector<8x96xf32>
    %343 = arith.truncf %341 : vector<8x32xf32> to vector<8x32xbf16>
    %cst_67 = arith.constant dense<0.000000e+00> : vector<8x96xf32>
    %344 = tpu.matmul %343, %277, %cst_67 {dimension_numbers = #tpu.dot_dimension_numbers<[1], [0], [0], [1], [0, 0, 1, 1], [], []>} : vector<8x32xbf16>, vector<32x96xbf16>, vector<8x96xf32> -> vector<8x96xf32>
    %345 = vector.extract_strided_slice %342 {offsets = [0, 0], sizes = [8, 32], strides = [1, 1]} : vector<8x96xf32> to vector<8x32xf32>
    %346 = vector.extract_strided_slice %344 {offsets = [0, 0], sizes = [8, 32], strides = [1, 1]} : vector<8x96xf32> to vector<8x32xf32>
    %347 = arith.addf %345, %346 : vector<8x32xf32>
    %348 = arith.negf %347 : vector<8x32xf32>
    %349 = math.exp %348 : vector<8x32xf32>
    %cst_68 = arith.constant 1.000000e+00 : f32
    %350 = vector.broadcast %cst_68 : f32 to vector<8x32xf32>
    %351 = arith.addf %350, %349 : vector<8x32xf32>
    %352 = arith.divf %350, %351 : vector<8x32xf32>
    %353 = vector.extract_strided_slice %342 {offsets = [0, 32], sizes = [8, 32], strides = [1, 1]} : vector<8x96xf32> to vector<8x32xf32>
    %354 = vector.extract_strided_slice %344 {offsets = [0, 32], sizes = [8, 32], strides = [1, 1]} : vector<8x96xf32> to vector<8x32xf32>
    %355 = arith.addf %353, %354 : vector<8x32xf32>
    %356 = arith.negf %355 : vector<8x32xf32>
    %357 = math.exp %356 : vector<8x32xf32>
    %cst_69 = arith.constant 1.000000e+00 : f32
    %358 = vector.broadcast %cst_69 : f32 to vector<8x32xf32>
    %359 = arith.addf %358, %357 : vector<8x32xf32>
    %360 = arith.divf %358, %359 : vector<8x32xf32>
    %361 = vector.extract_strided_slice %342 {offsets = [0, 64], sizes = [8, 32], strides = [1, 1]} : vector<8x96xf32> to vector<8x32xf32>
    %362 = vector.extract_strided_slice %344 {offsets = [0, 64], sizes = [8, 32], strides = [1, 1]} : vector<8x96xf32> to vector<8x32xf32>
    %363 = vector.broadcast %278 : vector<1x32xf32> to vector<8x32xf32>
    %364 = arith.addf %362, %363 : vector<8x32xf32>
    %365 = arith.mulf %352, %364 : vector<8x32xf32>
    %366 = arith.addf %361, %365 : vector<8x32xf32>
    %367 = math.tanh %366 : vector<8x32xf32>
    %cst_70 = arith.constant 1.000000e+00 : f32
    %368 = vector.broadcast %cst_70 : f32 to vector<8x32xf32>
    %369 = arith.subf %368, %360 : vector<8x32xf32>
    %370 = arith.mulf %369, %367 : vector<8x32xf32>
    %371 = arith.mulf %360, %341 : vector<8x32xf32>
    %372 = arith.addf %370, %371 : vector<8x32xf32>
    %373 = vector.extract_strided_slice %276 {offsets = [24, 0], sizes = [8, 96], strides = [1, 1]} : vector<64x96xf32> to vector<8x96xf32>
    %374 = arith.truncf %372 : vector<8x32xf32> to vector<8x32xbf16>
    %cst_71 = arith.constant dense<0.000000e+00> : vector<8x96xf32>
    %375 = tpu.matmul %374, %277, %cst_71 {dimension_numbers = #tpu.dot_dimension_numbers<[1], [0], [0], [1], [0, 0, 1, 1], [], []>} : vector<8x32xbf16>, vector<32x96xbf16>, vector<8x96xf32> -> vector<8x96xf32>
    %376 = vector.extract_strided_slice %373 {offsets = [0, 0], sizes = [8, 32], strides = [1, 1]} : vector<8x96xf32> to vector<8x32xf32>
    %377 = vector.extract_strided_slice %375 {offsets = [0, 0], sizes = [8, 32], strides = [1, 1]} : vector<8x96xf32> to vector<8x32xf32>
    %378 = arith.addf %376, %377 : vector<8x32xf32>
    %379 = arith.negf %378 : vector<8x32xf32>
    %380 = math.exp %379 : vector<8x32xf32>
    %cst_72 = arith.constant 1.000000e+00 : f32
    %381 = vector.broadcast %cst_72 : f32 to vector<8x32xf32>
    %382 = arith.addf %381, %380 : vector<8x32xf32>
    %383 = arith.divf %381, %382 : vector<8x32xf32>
    %384 = vector.extract_strided_slice %373 {offsets = [0, 32], sizes = [8, 32], strides = [1, 1]} : vector<8x96xf32> to vector<8x32xf32>
    %385 = vector.extract_strided_slice %375 {offsets = [0, 32], sizes = [8, 32], strides = [1, 1]} : vector<8x96xf32> to vector<8x32xf32>
    %386 = arith.addf %384, %385 : vector<8x32xf32>
    %387 = arith.negf %386 : vector<8x32xf32>
    %388 = math.exp %387 : vector<8x32xf32>
    %cst_73 = arith.constant 1.000000e+00 : f32
    %389 = vector.broadcast %cst_73 : f32 to vector<8x32xf32>
    %390 = arith.addf %389, %388 : vector<8x32xf32>
    %391 = arith.divf %389, %390 : vector<8x32xf32>
    %392 = vector.extract_strided_slice %373 {offsets = [0, 64], sizes = [8, 32], strides = [1, 1]} : vector<8x96xf32> to vector<8x32xf32>
    %393 = vector.extract_strided_slice %375 {offsets = [0, 64], sizes = [8, 32], strides = [1, 1]} : vector<8x96xf32> to vector<8x32xf32>
    %394 = vector.broadcast %278 : vector<1x32xf32> to vector<8x32xf32>
    %395 = arith.addf %393, %394 : vector<8x32xf32>
    %396 = arith.mulf %383, %395 : vector<8x32xf32>
    %397 = arith.addf %392, %396 : vector<8x32xf32>
    %398 = math.tanh %397 : vector<8x32xf32>
    %cst_74 = arith.constant 1.000000e+00 : f32
    %399 = vector.broadcast %cst_74 : f32 to vector<8x32xf32>
    %400 = arith.subf %399, %391 : vector<8x32xf32>
    %401 = arith.mulf %400, %398 : vector<8x32xf32>
    %402 = arith.mulf %391, %372 : vector<8x32xf32>
    %403 = arith.addf %401, %402 : vector<8x32xf32>
    %404 = vector.extract_strided_slice %276 {offsets = [32, 0], sizes = [8, 96], strides = [1, 1]} : vector<64x96xf32> to vector<8x96xf32>
    %405 = arith.truncf %403 : vector<8x32xf32> to vector<8x32xbf16>
    %cst_75 = arith.constant dense<0.000000e+00> : vector<8x96xf32>
    %406 = tpu.matmul %405, %277, %cst_75 {dimension_numbers = #tpu.dot_dimension_numbers<[1], [0], [0], [1], [0, 0, 1, 1], [], []>} : vector<8x32xbf16>, vector<32x96xbf16>, vector<8x96xf32> -> vector<8x96xf32>
    %407 = vector.extract_strided_slice %404 {offsets = [0, 0], sizes = [8, 32], strides = [1, 1]} : vector<8x96xf32> to vector<8x32xf32>
    %408 = vector.extract_strided_slice %406 {offsets = [0, 0], sizes = [8, 32], strides = [1, 1]} : vector<8x96xf32> to vector<8x32xf32>
    %409 = arith.addf %407, %408 : vector<8x32xf32>
    %410 = arith.negf %409 : vector<8x32xf32>
    %411 = math.exp %410 : vector<8x32xf32>
    %cst_76 = arith.constant 1.000000e+00 : f32
    %412 = vector.broadcast %cst_76 : f32 to vector<8x32xf32>
    %413 = arith.addf %412, %411 : vector<8x32xf32>
    %414 = arith.divf %412, %413 : vector<8x32xf32>
    %415 = vector.extract_strided_slice %404 {offsets = [0, 32], sizes = [8, 32], strides = [1, 1]} : vector<8x96xf32> to vector<8x32xf32>
    %416 = vector.extract_strided_slice %406 {offsets = [0, 32], sizes = [8, 32], strides = [1, 1]} : vector<8x96xf32> to vector<8x32xf32>
    %417 = arith.addf %415, %416 : vector<8x32xf32>
    %418 = arith.negf %417 : vector<8x32xf32>
    %419 = math.exp %418 : vector<8x32xf32>
    %cst_77 = arith.constant 1.000000e+00 : f32
    %420 = vector.broadcast %cst_77 : f32 to vector<8x32xf32>
    %421 = arith.addf %420, %419 : vector<8x32xf32>
    %422 = arith.divf %420, %421 : vector<8x32xf32>
    %423 = vector.extract_strided_slice %404 {offsets = [0, 64], sizes = [8, 32], strides = [1, 1]} : vector<8x96xf32> to vector<8x32xf32>
    %424 = vector.extract_strided_slice %406 {offsets = [0, 64], sizes = [8, 32], strides = [1, 1]} : vector<8x96xf32> to vector<8x32xf32>
    %425 = vector.broadcast %278 : vector<1x32xf32> to vector<8x32xf32>
    %426 = arith.addf %424, %425 : vector<8x32xf32>
    %427 = arith.mulf %414, %426 : vector<8x32xf32>
    %428 = arith.addf %423, %427 : vector<8x32xf32>
    %429 = math.tanh %428 : vector<8x32xf32>
    %cst_78 = arith.constant 1.000000e+00 : f32
    %430 = vector.broadcast %cst_78 : f32 to vector<8x32xf32>
    %431 = arith.subf %430, %422 : vector<8x32xf32>
    %432 = arith.mulf %431, %429 : vector<8x32xf32>
    %433 = arith.mulf %422, %403 : vector<8x32xf32>
    %434 = arith.addf %432, %433 : vector<8x32xf32>
    %435 = vector.extract_strided_slice %276 {offsets = [40, 0], sizes = [8, 96], strides = [1, 1]} : vector<64x96xf32> to vector<8x96xf32>
    %436 = arith.truncf %434 : vector<8x32xf32> to vector<8x32xbf16>
    %cst_79 = arith.constant dense<0.000000e+00> : vector<8x96xf32>
    %437 = tpu.matmul %436, %277, %cst_79 {dimension_numbers = #tpu.dot_dimension_numbers<[1], [0], [0], [1], [0, 0, 1, 1], [], []>} : vector<8x32xbf16>, vector<32x96xbf16>, vector<8x96xf32> -> vector<8x96xf32>
    %438 = vector.extract_strided_slice %435 {offsets = [0, 0], sizes = [8, 32], strides = [1, 1]} : vector<8x96xf32> to vector<8x32xf32>
    %439 = vector.extract_strided_slice %437 {offsets = [0, 0], sizes = [8, 32], strides = [1, 1]} : vector<8x96xf32> to vector<8x32xf32>
    %440 = arith.addf %438, %439 : vector<8x32xf32>
    %441 = arith.negf %440 : vector<8x32xf32>
    %442 = math.exp %441 : vector<8x32xf32>
    %cst_80 = arith.constant 1.000000e+00 : f32
    %443 = vector.broadcast %cst_80 : f32 to vector<8x32xf32>
    %444 = arith.addf %443, %442 : vector<8x32xf32>
    %445 = arith.divf %443, %444 : vector<8x32xf32>
    %446 = vector.extract_strided_slice %435 {offsets = [0, 32], sizes = [8, 32], strides = [1, 1]} : vector<8x96xf32> to vector<8x32xf32>
    %447 = vector.extract_strided_slice %437 {offsets = [0, 32], sizes = [8, 32], strides = [1, 1]} : vector<8x96xf32> to vector<8x32xf32>
    %448 = arith.addf %446, %447 : vector<8x32xf32>
    %449 = arith.negf %448 : vector<8x32xf32>
    %450 = math.exp %449 : vector<8x32xf32>
    %cst_81 = arith.constant 1.000000e+00 : f32
    %451 = vector.broadcast %cst_81 : f32 to vector<8x32xf32>
    %452 = arith.addf %451, %450 : vector<8x32xf32>
    %453 = arith.divf %451, %452 : vector<8x32xf32>
    %454 = vector.extract_strided_slice %435 {offsets = [0, 64], sizes = [8, 32], strides = [1, 1]} : vector<8x96xf32> to vector<8x32xf32>
    %455 = vector.extract_strided_slice %437 {offsets = [0, 64], sizes = [8, 32], strides = [1, 1]} : vector<8x96xf32> to vector<8x32xf32>
    %456 = vector.broadcast %278 : vector<1x32xf32> to vector<8x32xf32>
    %457 = arith.addf %455, %456 : vector<8x32xf32>
    %458 = arith.mulf %445, %457 : vector<8x32xf32>
    %459 = arith.addf %454, %458 : vector<8x32xf32>
    %460 = math.tanh %459 : vector<8x32xf32>
    %cst_82 = arith.constant 1.000000e+00 : f32
    %461 = vector.broadcast %cst_82 : f32 to vector<8x32xf32>
    %462 = arith.subf %461, %453 : vector<8x32xf32>
    %463 = arith.mulf %462, %460 : vector<8x32xf32>
    %464 = arith.mulf %453, %434 : vector<8x32xf32>
    %465 = arith.addf %463, %464 : vector<8x32xf32>
    %466 = vector.extract_strided_slice %276 {offsets = [48, 0], sizes = [8, 96], strides = [1, 1]} : vector<64x96xf32> to vector<8x96xf32>
    %467 = arith.truncf %465 : vector<8x32xf32> to vector<8x32xbf16>
    %cst_83 = arith.constant dense<0.000000e+00> : vector<8x96xf32>
    %468 = tpu.matmul %467, %277, %cst_83 {dimension_numbers = #tpu.dot_dimension_numbers<[1], [0], [0], [1], [0, 0, 1, 1], [], []>} : vector<8x32xbf16>, vector<32x96xbf16>, vector<8x96xf32> -> vector<8x96xf32>
    %469 = vector.extract_strided_slice %466 {offsets = [0, 0], sizes = [8, 32], strides = [1, 1]} : vector<8x96xf32> to vector<8x32xf32>
    %470 = vector.extract_strided_slice %468 {offsets = [0, 0], sizes = [8, 32], strides = [1, 1]} : vector<8x96xf32> to vector<8x32xf32>
    %471 = arith.addf %469, %470 : vector<8x32xf32>
    %472 = arith.negf %471 : vector<8x32xf32>
    %473 = math.exp %472 : vector<8x32xf32>
    %cst_84 = arith.constant 1.000000e+00 : f32
    %474 = vector.broadcast %cst_84 : f32 to vector<8x32xf32>
    %475 = arith.addf %474, %473 : vector<8x32xf32>
    %476 = arith.divf %474, %475 : vector<8x32xf32>
    %477 = vector.extract_strided_slice %466 {offsets = [0, 32], sizes = [8, 32], strides = [1, 1]} : vector<8x96xf32> to vector<8x32xf32>
    %478 = vector.extract_strided_slice %468 {offsets = [0, 32], sizes = [8, 32], strides = [1, 1]} : vector<8x96xf32> to vector<8x32xf32>
    %479 = arith.addf %477, %478 : vector<8x32xf32>
    %480 = arith.negf %479 : vector<8x32xf32>
    %481 = math.exp %480 : vector<8x32xf32>
    %cst_85 = arith.constant 1.000000e+00 : f32
    %482 = vector.broadcast %cst_85 : f32 to vector<8x32xf32>
    %483 = arith.addf %482, %481 : vector<8x32xf32>
    %484 = arith.divf %482, %483 : vector<8x32xf32>
    %485 = vector.extract_strided_slice %466 {offsets = [0, 64], sizes = [8, 32], strides = [1, 1]} : vector<8x96xf32> to vector<8x32xf32>
    %486 = vector.extract_strided_slice %468 {offsets = [0, 64], sizes = [8, 32], strides = [1, 1]} : vector<8x96xf32> to vector<8x32xf32>
    %487 = vector.broadcast %278 : vector<1x32xf32> to vector<8x32xf32>
    %488 = arith.addf %486, %487 : vector<8x32xf32>
    %489 = arith.mulf %476, %488 : vector<8x32xf32>
    %490 = arith.addf %485, %489 : vector<8x32xf32>
    %491 = math.tanh %490 : vector<8x32xf32>
    %cst_86 = arith.constant 1.000000e+00 : f32
    %492 = vector.broadcast %cst_86 : f32 to vector<8x32xf32>
    %493 = arith.subf %492, %484 : vector<8x32xf32>
    %494 = arith.mulf %493, %491 : vector<8x32xf32>
    %495 = arith.mulf %484, %465 : vector<8x32xf32>
    %496 = arith.addf %494, %495 : vector<8x32xf32>
    %497 = vector.extract_strided_slice %276 {offsets = [56, 0], sizes = [8, 96], strides = [1, 1]} : vector<64x96xf32> to vector<8x96xf32>
    %498 = arith.truncf %496 : vector<8x32xf32> to vector<8x32xbf16>
    %cst_87 = arith.constant dense<0.000000e+00> : vector<8x96xf32>
    %499 = tpu.matmul %498, %277, %cst_87 {dimension_numbers = #tpu.dot_dimension_numbers<[1], [0], [0], [1], [0, 0, 1, 1], [], []>} : vector<8x32xbf16>, vector<32x96xbf16>, vector<8x96xf32> -> vector<8x96xf32>
    %500 = vector.extract_strided_slice %497 {offsets = [0, 0], sizes = [8, 32], strides = [1, 1]} : vector<8x96xf32> to vector<8x32xf32>
    %501 = vector.extract_strided_slice %499 {offsets = [0, 0], sizes = [8, 32], strides = [1, 1]} : vector<8x96xf32> to vector<8x32xf32>
    %502 = arith.addf %500, %501 : vector<8x32xf32>
    %503 = arith.negf %502 : vector<8x32xf32>
    %504 = math.exp %503 : vector<8x32xf32>
    %cst_88 = arith.constant 1.000000e+00 : f32
    %505 = vector.broadcast %cst_88 : f32 to vector<8x32xf32>
    %506 = arith.addf %505, %504 : vector<8x32xf32>
    %507 = arith.divf %505, %506 : vector<8x32xf32>
    %508 = vector.extract_strided_slice %497 {offsets = [0, 32], sizes = [8, 32], strides = [1, 1]} : vector<8x96xf32> to vector<8x32xf32>
    %509 = vector.extract_strided_slice %499 {offsets = [0, 32], sizes = [8, 32], strides = [1, 1]} : vector<8x96xf32> to vector<8x32xf32>
    %510 = arith.addf %508, %509 : vector<8x32xf32>
    %511 = arith.negf %510 : vector<8x32xf32>
    %512 = math.exp %511 : vector<8x32xf32>
    %cst_89 = arith.constant 1.000000e+00 : f32
    %513 = vector.broadcast %cst_89 : f32 to vector<8x32xf32>
    %514 = arith.addf %513, %512 : vector<8x32xf32>
    %515 = arith.divf %513, %514 : vector<8x32xf32>
    %516 = vector.extract_strided_slice %497 {offsets = [0, 64], sizes = [8, 32], strides = [1, 1]} : vector<8x96xf32> to vector<8x32xf32>
    %517 = vector.extract_strided_slice %499 {offsets = [0, 64], sizes = [8, 32], strides = [1, 1]} : vector<8x96xf32> to vector<8x32xf32>
    %518 = vector.broadcast %278 : vector<1x32xf32> to vector<8x32xf32>
    %519 = arith.addf %517, %518 : vector<8x32xf32>
    %520 = arith.mulf %507, %519 : vector<8x32xf32>
    %521 = arith.addf %516, %520 : vector<8x32xf32>
    %522 = math.tanh %521 : vector<8x32xf32>
    %cst_90 = arith.constant 1.000000e+00 : f32
    %523 = vector.broadcast %cst_90 : f32 to vector<8x32xf32>
    %524 = arith.subf %523, %515 : vector<8x32xf32>
    %525 = arith.mulf %524, %522 : vector<8x32xf32>
    %526 = arith.mulf %515, %496 : vector<8x32xf32>
    %527 = arith.addf %525, %526 : vector<8x32xf32>
    %528 = tpu.concatenate %310, %341, %372, %403, %434, %465, %496, %527 in 0 : vector<8x32xf32>, vector<8x32xf32>, vector<8x32xf32>, vector<8x32xf32>, vector<8x32xf32>, vector<8x32xf32>, vector<8x32xf32>, vector<8x32xf32> -> vector<64x32xf32>
    %529 = arith.truncf %528 : vector<64x32xf32> to vector<64x32xbf16>
    %c0_91 = arith.constant 0 : index
    %c0_92 = arith.constant 0 : index
    %530 = vector.load %arg12[%c0_91, %c0_92] : memref<32x4xbf16, #tpu.memory_space<vmem>>, vector<32x4xbf16>
    %cst_93 = arith.constant dense<0.000000e+00> : vector<64x4xf32>
    %531 = tpu.matmul %529, %530, %cst_93 {dimension_numbers = #tpu.dot_dimension_numbers<[1], [0], [0], [1], [0, 0, 1, 1], [], []>} : vector<64x32xbf16>, vector<32x4xbf16>, vector<64x4xf32> -> vector<64x4xf32>
    %c0_94 = arith.constant 0 : index
    %c0_95 = arith.constant 0 : index
    %532 = vector.load %arg13[%c0_94, %c0_95] : memref<1x4xf32, #tpu.memory_space<vmem>>, vector<1x4xf32>
    %533 = vector.broadcast %532 : vector<1x4xf32> to vector<64x4xf32>
    %534 = arith.addf %531, %533 : vector<64x4xf32>
    %535 = arith.negf %534 : vector<64x4xf32>
    %536 = math.exp %535 : vector<64x4xf32>
    %cst_96 = arith.constant 1.000000e+00 : f32
    %537 = vector.broadcast %cst_96 : f32 to vector<64x4xf32>
    %538 = arith.addf %537, %536 : vector<64x4xf32>
    %539 = arith.divf %537, %538 : vector<64x4xf32>
    %540 = vector.shape_cast %539 : vector<64x4xf32> to vector<8x8x4xf32>
    %c0_97 = arith.constant 0 : index
    %c0_98 = arith.constant 0 : index
    %c0_99 = arith.constant 0 : index
    %541 = vector.load %arg14[%c0_97, %c0_98, %c0_99] : memref<8x8x4xf32, #tpu.memory_space<vmem>>, vector<8x8x4xf32>
    tpu.vector_store %arg14[%c0_97, %c0_98, %c0_99], %540 {strides = array<i32>} : memref<8x8x4xf32, #tpu.memory_space<vmem>>, vector<8x8x4xf32>,
    return
  }
  func.func @transform_0(%arg0: i32) -> (i32, i32, i32) {
    %c0_i32 = arith.constant 0 : i32
    %c0_i32_0 = arith.constant 0 : i32
    %c0_i32_1 = arith.constant 0 : i32
    return %c0_i32, %arg0, %c0_i32_0 : i32, i32, i32
  }
  func.func @transform_1(%arg0: i32) -> (i32, i32) {
    %c0_i32 = arith.constant 0 : i32
    %c0_i32_0 = arith.constant 0 : i32
    %c0_i32_1 = arith.constant 0 : i32
    return %c0_i32, %c0_i32_0 : i32, i32
  }
  func.func @transform_2(%arg0: i32) -> (i32, i32) {
    %c0_i32 = arith.constant 0 : i32
    %c0_i32_0 = arith.constant 0 : i32
    %c0_i32_1 = arith.constant 0 : i32
    return %c0_i32, %c0_i32_0 : i32, i32
  }
  func.func @transform_3(%arg0: i32) -> (i32, i32) {
    %c0_i32 = arith.constant 0 : i32
    %c0_i32_0 = arith.constant 0 : i32
    %c0_i32_1 = arith.constant 0 : i32
    return %c0_i32, %c0_i32_0 : i32, i32
  }
  func.func @transform_4(%arg0: i32) -> (i32, i32) {
    %c0_i32 = arith.constant 0 : i32
    %c0_i32_0 = arith.constant 0 : i32
    %c0_i32_1 = arith.constant 0 : i32
    return %c0_i32, %c0_i32_0 : i32, i32
  }
  func.func @transform_5(%arg0: i32) -> (i32, i32) {
    %c0_i32 = arith.constant 0 : i32
    %c0_i32_0 = arith.constant 0 : i32
    %c0_i32_1 = arith.constant 0 : i32
    return %c0_i32, %c0_i32_0 : i32, i32
  }
  func.func @transform_6(%arg0: i32) -> (i32, i32) {
    %c0_i32 = arith.constant 0 : i32
    %c0_i32_0 = arith.constant 0 : i32
    %c0_i32_1 = arith.constant 0 : i32
    return %c0_i32, %c0_i32_0 : i32, i32
  }
  func.func @transform_7(%arg0: i32) -> (i32, i32) {
    %c0_i32 = arith.constant 0 : i32
    %c0_i32_0 = arith.constant 0 : i32
    %c0_i32_1 = arith.constant 0 : i32
    return %c0_i32, %c0_i32_0 : i32, i32
  }
  func.func @transform_8(%arg0: i32) -> (i32, i32) {
    %c0_i32 = arith.constant 0 : i32
    %c0_i32_0 = arith.constant 0 : i32
    %c0_i32_1 = arith.constant 0 : i32
    return %c0_i32, %c0_i32_0 : i32, i32
  }
  func.func @transform_9(%arg0: i32) -> (i32, i32) {
    %c0_i32 = arith.constant 0 : i32
    %c0_i32_0 = arith.constant 0 : i32
    %c0_i32_1 = arith.constant 0 : i32
    return %c0_i32, %c0_i32_0 : i32, i32
  }
  func.func @transform_10(%arg0: i32) -> (i32, i32) {
    %c0_i32 = arith.constant 0 : i32
    %c0_i32_0 = arith.constant 0 : i32
    %c0_i32_1 = arith.constant 0 : i32
    return %c0_i32, %c0_i32_0 : i32, i32
  }
  func.func @transform_11(%arg0: i32) -> (i32, i32) {
    %c0_i32 = arith.constant 0 : i32
    %c0_i32_0 = arith.constant 0 : i32
    %c0_i32_1 = arith.constant 0 : i32
    return %c0_i32, %c0_i32_0 : i32, i32
  }
  func.func @transform_12(%arg0: i32) -> (i32, i32) {
    %c0_i32 = arith.constant 0 : i32
    %c0_i32_0 = arith.constant 0 : i32
    %c0_i32_1 = arith.constant 0 : i32
    return %c0_i32, %c0_i32_0 : i32, i32
  }
  func.func @transform_13(%arg0: i32) -> (i32, i32, i32) {
    %c0_i32 = arith.constant 0 : i32
    %c0_i32_0 = arith.constant 0 : i32
    %c0_i32_1 = arith.constant 0 : i32
    return %c0_i32, %arg0, %c0_i32_0 : i32, i32, i32
  }
}

</mosaic_0001>

<bundles_post_ra>
// kernel: autoencoder_pallas.1
= control target key start
LH: loop header
LB: loop body
LE: loop exit
PB: predicated region body
PF: predicated region fallthrough
CT: control target
= control target key end

     0   :  { %s3027_s25 = smov 0   ;;  %s3029_s26 = smov 0   ;;  %s3536_s0 = inlined_call_operand.vmem [shape: f32[8,16,4], index: 0, kind: input, shape index: {}]   ;;  %s3537_s1 = inlined_call_operand.vmem [shape: bf16[4,96], index: 1, kind: input, shape index: {}]   ;;  %s3538_s2 = inlined_call_operand.vmem [shape: bf16[32,96], index: 2, kind: input, shape index: {}]   ;;  %s3539_s3 = inlined_call_operand.vmem [shape: f32[1,96], index: 3, kind: input, shape index: {}]   ;;  %s3540_s4 = inlined_call_operand.vmem [shape: f32[1,32], index: 4, kind: input, shape index: {}]   ;;  %s3541_s5 = inlined_call_operand.vmem [shape: bf16[32,32], index: 5, kind: input, shape index: {}]   ;;  %s3542_s6 = inlined_call_operand.vmem [shape: f32[1,32], index: 6, kind: input, shape index: {}]   ;;  %s3543_s7 = inlined_call_operand.vmem [shape: bf16[32,96], index: 7, kind: input, shape index: {}]   ;;  %s3544_s8 = inlined_call_operand.vmem [shape: bf16[32,96], index: 8, kind: input, shape index: {}]   ;;  %s3545_s9 = inlined_call_operand.vmem [shape: f32[1,96], index: 9, kind: input, shape index: {}]   ;;  %s3546_s10 = inlined_call_operand.vmem [shape: f32[1,32], index: 10, kind: input, shape index: {}]   ;;  %s3547_s11 = inlined_call_operand.vmem [shape: bf16[32,4], index: 11, kind: input, shape index: {}]   ;;  %s3548_s12 = inlined_call_operand.vmem [shape: f32[1,4], index: 12, kind: input, shape index: {}]   ;;  %s3549_s13 = inlined_call_operand.vmem [shape: f32[8,16,4], index: 13, kind: output, shape index: {}]  }
   0x1   :  { %s3031_s27 = smov 0  }
   0x2 LB: > { %s2389_s28 = sadd.s32 4294967295, %s2950_s27   ;;  %s3044_s29 = sadd.s32 1, %s2950_s27   ;;  %s2950_s27 = sphi %s3031_s27, %s3553_s27   ;;  %s2946_s26 = sphi %s3029_s26, %s3552_s26   ;;  %s2942_s25 = sphi %s3027_s25, %s3551_s25  }
   0x3   : > { %s27_s30 = ssub.s32 %s2950_s27, %s3044_s29  ;;  %s30_s14 = sadd.s32 1, %s2946_s26 }
   0x4   : > { %p28_p0 = scmp.eq.s32.totalorder %s27_s30, 0  ;;  %p37_p1 = scmp.ne.s32.totalorder %s2946_s26, %s2942_s25 }
   0x5   : > { %p38_p2 = scmp.eq.s32.totalorder %s2950_s27, 0  ;;  %p319_p3 = scmp.eq.s32.totalorder %s2389_s28, 1 }
   0x6   : > { %s3055_s15 = scalar_select %p28_p0, %s2946_s26, %s30_s14  }
   0x7   : > { %p39_p4 = por %p38_p2, %p37_p1  ;;  %p3057_p5 = por %p319_p3, %p37_p1 }
   0x8   : > { %p2392_p6 = scmp.ge.s32.totalorder %s2950_s27, 2 }
   0xa   : > { %377 = sbr.rel (%p2392_p6) target bundleno = 25 (0x19), region = 64 }
  0x11   : > { %380 = sbr.rel (!%p39_p4) target bundleno = 25 (0x19), region = 68  ;;  %s382_s17 = sand.u32 (%p39_p4), 1, %s2946_s26  }
  0x12   : > { %s2394_s18 = sshll.u32 (%p39_p4), %s2950_s27, 3  ;;  %s2393_s19 = sshll.u32 (%p39_p4), %s382_s17, 6 }
  0x13   : > { %s386_s22 = scalar_lea.vmem (%p39_p4), %s3536_s0, %s2394_s18  ;;  %s384_s23 = scalar_lea.vmem (%p39_p4), [#allocation2], %s2393_s19 }
  0x14   : > { %v428_v0 = vld [vmem:[%s386_s22] sm:$0xff] (%p39_p4)  ;;  %v430_v1 = vld [vmem:[%s386_s22 + $0x10] sm:$0xff] (%p39_p4) }
  0x15   : > { %v432_v2 = vld [vmem:[%s386_s22 + $0x20] sm:$0xff] (%p39_p4)  ;;  %429 = vst [vmem:[%s384_s23] sm:$0xff] (%p39_p4), %v428_v0  ;;  %431 = vst [vmem:[%s384_s23 + $0x8] sm:$0xff] (%p39_p4), %v430_v1  ;;  %v434_v3 = vld [vmem:[%s386_s22 + $0x30] sm:$0xff] (%p39_p4) }
  0x16   : > { %433 = vst [vmem:[%s384_s23 + $0x10] sm:$0xff] (%p39_p4), %v432_v2  ;;  %v436_v4 = vld [vmem:[%s386_s22 + $0x40] sm:$0xff] (%p39_p4)  ;;  %v438_v5 = vld [vmem:[%s386_s22 + $0x50] sm:$0xff] (%p39_p4)  ;;  %435 = vst [vmem:[%s384_s23 + $0x18] sm:$0xff] (%p39_p4), %v434_v3 }
  0x17   : > { %437 = vst [vmem:[%s384_s23 + $0x20] sm:$0xff] (%p39_p4), %v436_v4  ;;  %439 = vst [vmem:[%s384_s23 + $0x28] sm:$0xff] (%p39_p4), %v438_v5  ;;  %v440_v6 = vld [vmem:[%s386_s22 + $0x60] sm:$0xff] (%p39_p4)  ;;  %v442_v7 = vld [vmem:[%s386_s22 + $0x70] sm:$0xff] (%p39_p4) }
  0x18   : > { %441 = vst [vmem:[%s384_s23 + $0x30] sm:$0xff] %v440_v6  ;;  %443 = vst [vmem:[%s384_s23 + $0x38] sm:$0xff] %v442_v7 }
  0x19 PF: > { %p2395_p7 = scmp.ge.s32.totalorder %s2950_s27, 1  ;;  %p448_p8 = scmp.lt.s32.totalorder %s2950_s27, 3 }
  0x1b   : > { %p449_p9 = pnand %p2395_p7, %p448_p8 }
  0x1c   : > { %v510_v8 = vld [vmem:[%s3537_s1] sm:$0x3] (!%p449_p9)  ;;  %vm531_vm0 = vcmask (!%p449_p9), 1041408   ;;  %s455_s14 = sand.u32 (!%p449_p9), 1, %s2942_s25   ;;  %vm518_vm1 = vcmask (!%p449_p9), 31744   ;;  %v2952_v13 = vmov (!%p449_p9), 0.0  }
  0x1d   : > { %452 = sbr.rel (%p449_p9) target bundleno = 11423 (0x2c9f), region = 106  ;;  %2728 = vmatprep.subr.msk.bf16.mxu1 (!%p449_p9), %vm531_vm0, %v510_v8  ;;  %v533_v9 = vsel (!%p449_p9), %vm531_vm0, %v510_v8, 0  ;;  %s3073_s17 = sshll.u32 (!%p449_p9), %s455_s14, 6  ;;  %2727 = vmatprep.subr.msk.bf16.mxu0 (!%p449_p9), %vm531_vm0, %v510_v8  ;;  %v3078_v10 = vld [vmem:[%s3538_s2] sm:$0xff] (!%p449_p9)   ;;  %v3087_v23 = vld [vmem:[%s3538_s2 + $0x8] sm:$0xff] (!%p449_p9)   ;;  %vm2953_vm2 = vmmov (!%p449_p9), 0  }
  0x1e   : > { %2726 = vmatpush3.bf16.msra.mxu1 (!%p449_p9), %v533_v9  ;;  %2552 = vmatpush3.bf16.msra.mxu0 (!%p449_p9), %v533_v9  ;;  %s457_s20 = scalar_lea.vmem (!%p449_p9), [#allocation2], %s3073_s17  ;;  %v2406_v25 = vld [vmem:[%s3540_s4] ss:$0 sm:$0xff] (!%p449_p9)  ;;  %s2954_s24 = smov (!%p449_p9), 64   ;;  %v2955_v26 = vmov (!%p449_p9), 0   ;;  %vm617_vm3 = vcmask (!%p449_p9), 261120  }
  0x1f   : > { %v502_v11 = vld [vmem:[%s457_s20 + $0x20] sm:$0xff] (!%p449_p9)  ;;  %v503_v12 = vld [vmem:[%s457_s20 + $0x28] sm:$0xff] (!%p449_p9)  ;;  %2561 = vmatprep.subr.bf16.mxu1 (!%p449_p9), %v2952_v13  ;;  %v504_v14 = vld [vmem:[%s457_s20 + $0x30] sm:$0xff] (!%p449_p9)  ;;  %2577 = vmatprep.subr.bf16.mxu0 (!%p449_p9), %v2952_v13  ;;  %s2956_s18 = smov (!%p449_p9), 96  }
  0x20   : > { %v508_v15 = vpack.c.bf16 (!%p449_p9), %v503_v12, %v502_v11  ;;  %v505_v16 = vld [vmem:[%s457_s20 + $0x38] sm:$0xff] (!%p449_p9)  ;;  %v498_v17 = vld [vmem:[%s457_s20] sm:$0xff] (!%p449_p9)  ;;  %v499_v18 = vld [vmem:[%s457_s20 + $0x8] sm:$0xff] (!%p449_p9)  ;;  %673 = vrot.lane.b32.xlu0 (!%p449_p9), %v2406_v25, %s2954_s24 }
  0x21   : > { %v509_v19 = vpack.c.bf16 (!%p449_p9), %v505_v16, %v504_v14  ;;  %v506_v20 = vpack.c.bf16 (!%p449_p9), %v499_v18, %v498_v17  ;;  %v500_v21 = vld [vmem:[%s457_s20 + $0x10] sm:$0xff] (!%p449_p9)  ;;  %v501_v22 = vld [vmem:[%s457_s20 + $0x18] sm:$0xff] (!%p449_p9)  ;;  %v2398_v27 = vld [vmem:[%s3539_s3] ss:$0 sm:$0xff] (!%p449_p9) }
  0x22   : > { %2557 = vmatprep.mubr.msk.bf16.mxu1 (!%p449_p9), %vm518_vm1, %v508_v15  ;;  %v507_v24 = vpack.c.bf16 (!%p449_p9), %v501_v22, %v500_v21 }
  0x23   : > { %2558 = vmatmul.mubr.msk.bf16.vlgmr.msra.gmra.mrb[0].mxu1 (!%p449_p9), %vm518_vm1, %v509_v19  ;;  %2553 = vmatprep.mubr.msk.bf16.mxu0 (!%p449_p9), %vm518_vm1, %v506_v20 }
  0x24   : > { %2562 = vmatpush3.bf16.msra.mxu1 %v3078_v10  ;;  %2554 = vmatmul.mubr.msk.bf16.vlgmr.msra.gmra.mrb[0].mxu0 %vm518_vm1, %v507_v24 }
  0x25   : > { %2563 = vmatprep.subr.bf16.mxu1 %v2952_v13  ;;  %2565 = vmatprep.mubr.msk.bf16.mxu1 %vm2953_vm2, %v2952_v13 }
  0x26   : > { %2578 = vmatpush3.bf16.msra.mxu0 %v3078_v10  ;;  %2581 = vmatprep.mubr.msk.bf16.mxu0 %vm2953_vm2, %v2952_v13 }
  0x27   : > { %2579 = vmatprep.subr.bf16.mxu0 %v2952_v13 }
  0x28   : > { %2564 = vmatpush3.bf16.msra.mxu1 %v3087_v23 }
  0x29   : > { %2569 = vmatprep.subr.bf16.mxu1 %v2952_v13 }
  0x2a   : > { %2580 = vmatpush3.bf16.msra.mxu0 %v3087_v23 }
  0x2b   : > { %2566 = vmatmul.mubr.bf16.vlgmr.msra.gmra.mrb[4].mxu1 %v2955_v26  ;;  %2593 = vmatprep.subr.bf16.mxu0 %v2952_v13 }
  0x2c   : > { %2570 = vmatpush3.bf16.msra.mxu1 %v3078_v10  ;;  %2573 = vmatprep.mubr.msk.bf16.mxu1 %vm2953_vm2, %v2952_v13 }
  0x2d   : > { %2571 = vmatprep.subr.bf16.mxu1 %v2952_v13 }
  0x30   : > { %2572 = vmatpush3.bf16.msra.mxu1 %v3087_v23 }
  0x31   : > { %2585 = vmatprep.subr.bf16.mxu1 %v2952_v13 }
  0x92   : > { %v3130_v43 = vpop.permute.xlu0 %673 }
  0xf6   : > { %v2559_v28 = vpop.f32.mrb[0].mxu1 }
  0xf7   : > { %v3118_v29 = vadd.f32 %v2559_v28, %v2398_v27  ;;  %v585_v30 = vpop.f32.mrb[1].mxu1  ;;  %v2555_v31 = vpop.f32.mrb[0].mxu0 }
  0xf8   : > { %v3120_v32 = vadd.f32 %v2398_v27, %v585_v30  ;;  %v2560_v33 = vpop.f32.mrb[2].mxu1  ;;  %v3122_v34 = vadd.f32 %v2555_v31, %v2398_v27  ;;  %v569_v35 = vpop.f32.mrb[1].mxu0 }
  0xf9   : > { %v3124_v36 = vadd.f32 %v2560_v33, %v2398_v27  ;;  %v588_v37 = vpop.f32.mrb[3].mxu1  ;;  %v2556_v38 = vpop.f32.mrb[2].mxu0  ;;  %v570_v49 = vadd.f32 %v2398_v27, %v569_v35 }
  0xfa   : > { %v3126_v39 = vadd.f32 %v2398_v27, %v588_v37  ;;  %v3128_v40 = vadd.f32 %v2556_v38, %v2398_v27  ;;  %v572_v41 = vpop.f32.mrb[3].mxu0 }
  0xfb   : > { %v573_v42 = vadd.f32 %v2398_v27, %v572_v41 }
  0xfe   : > { %v655_v44 = vpop.f32.mrb[4].mxu1 }
  0xff   : > { %v676_v45 = vadd.f32 %v3130_v43, %v655_v44  ;;  %v2567_v46 = vpop.f32.mrb[5].mxu1  ;;  %v661_v50 = vadd.f32 %v655_v44, %v570_v49 }
 0x100   : > { %v658_v47 = vpop.f32.mrb[6].mxu1 }
 0x101   : > { %678 = vrot.lane.b32.xlu0 %v676_v45, %s2954_s24  ;;  %v2568_v48 = vpop.f32.mrb[7].mxu1  ;;  %v2405_v51 = vmul.f32 -1.442695, %v661_v50 }
 0x103   : > { %2768 = vpow2.f32 %v2405_v51 }
 0x10d   : > { %v2769_v52 = vpop.eup %2768 }
 0x10e   : > { %v665_v53 = vadd.f32 1.0, %v2769_v52 }
 0x110   : > { %2770 = vrcp.f32 %v665_v53 }
 0x11a   : > { %v2771_v54 = vpop.eup %2770 }
 0x11b   : > { %v688_v60 = vsub.f32 1.0, %v2771_v54  ;;  %v694_v62 = vmul.f32 0.0, %v2771_v54 }
 0x173   : > { %v679_v55 = vpop.permute.xlu0 %678 }
 0x174   : > { %v681_v56 = vmul.f32 %v2771_v54, %v679_v55 }
 0x176   : > { %683 = vrot.lane.b32.xlu1 %v681_v56, %s2954_s24 }
 0x1e8   : > { %v684_v57 = vpop.permute.xlu1 %683 }
 0x1e9   : > { %v686_v58 = vadd.f32 %v684_v57, %v570_v49 }
 0x1eb   : > { %2772 = vtanh.f32 %v686_v58 }
 0x1f5   : > { %v2773_v59 = vpop.eup %2772 }
 0x1f6   : > { %690 = vrot.lane.b32.xlu1 %v2773_v59, %s2956_s18 }
 0x268   : > { %v691_v61 = vpop.permute.xlu1 %690 }
 0x269   : > { %v693_v63 = vmul.f32 %v691_v61, %v688_v60 }
 0x26b   : > { %v3136_v0 = vadd.f32 %v694_v62, %v693_v63 }
 0x26d   : > { %v696_v1 = vpack.c.bf16 %v3136_v0, %v3136_v0 }
 0x26f   : > { %698 = vrot.lane.b32.xlu0 %v696_v1, %s2956_s18 }
 0x2e1   : > { %v699_v2 = vpop.permute.xlu0 %698 }
 0x2e2   : > { %2574 = vmatmul.mubr.msk.bf16.vlgmr.msra.gmra.mrb[8].mxu1 %vm617_vm3, %v699_v2 }
 0x2e3   : > { %2586 = vmatpush3.bf16.msra.mxu1 %v3078_v10  ;;  %2589 = vmatprep.mubr.msk.bf16.mxu1 %vm2953_vm2, %v2952_v13 }
 0x2e4   : > { %2587 = vmatprep.subr.bf16.mxu1 %v2952_v13 }
 0x2e7   : > { %2588 = vmatpush3.bf16.msra.mxu1 %v3087_v23 }
 0x2e8   : > { %2601 = vmatprep.subr.bf16.mxu1 %v2952_v13 }
 0x3b5   : > { %v737_v3 = vpop.f32.mrb[8].mxu1 }
 0x3b6   : > { %v750_v4 = vadd.f32 %v737_v3, %v3130_v43  ;;  %v2575_v5 = vpop.f32.mrb[9].mxu1  ;;  %v743_v8 = vadd.f32 %v737_v3, %v573_v42 }
 0x3b7   : > { %v740_v6 = vpop.f32.mrb[10].mxu1 }
 0x3b8   : > { %752 = vrot.lane.b32.xlu1 %v750_v4, %s2954_s24  ;;  %v2576_v7 = vpop.f32.mrb[11].mxu1  ;;  %v2408_v9 = vmul.f32 -1.442695, %v743_v8 }
 0x3ba   : > { %2774 = vpow2.f32 %v2408_v9 }
 0x3c4   : > { %v2775_v11 = vpop.eup %2774 }
 0x3c5   : > { %v747_v12 = vadd.f32 1.0, %v2775_v11 }
 0x3c7   : > { %2776 = vrcp.f32 %v747_v12 }
 0x3d1   : > { %v2777_v14 = vpop.eup %2776 }
 0x3d2   : > { %v762_v20 = vsub.f32 1.0, %v2777_v14  ;;  %v768_v22 = vmul.f32 %v2777_v14, %v3136_v0 }
 0x42a   : > { %v753_v15 = vpop.permute.xlu1 %752 }
 0x42b   : > { %v755_v16 = vmul.f32 %v2777_v14, %v753_v15 }
 0x42d   : > { %757 = vrot.lane.b32.xlu0 %v755_v16, %s2954_s24 }
 0x49f   : > { %v758_v17 = vpop.permute.xlu0 %757 }
 0x4a0   : > { %v760_v18 = vadd.f32 %v758_v17, %v573_v42 }
 0x4a2   : > { %2778 = vtanh.f32 %v760_v18 }
 0x4ac   : > { %v2779_v19 = vpop.eup %2778 }
 0x4ad   : > { %764 = vrot.lane.b32.xlu1 %v2779_v19, %s2956_s18 }
 0x51f   : > { %v765_v21 = vpop.permute.xlu1 %764 }
 0x520   : > { %v767_v24 = vmul.f32 %v765_v21, %v762_v20 }
 0x522   : > { %v3153_v25 = vadd.f32 %v768_v22, %v767_v24 }
 0x524   : > { %v770_v27 = vpack.c.bf16 %v3153_v25, %v3153_v25 }
 0x526   : > { %772 = vrot.lane.b32.xlu0 %v770_v27, %s2956_s18 }
 0x598   : > { %v773_v28 = vpop.permute.xlu0 %772 }
 0x599   : > { %2582 = vmatmul.mubr.msk.bf16.vlgmr.msra.gmra.mrb[4].mxu0 %vm617_vm3, %v773_v28 }
 0x59a   : > { %2594 = vmatpush3.bf16.msra.mxu0 %v3078_v10  ;;  %2597 = vmatprep.mubr.msk.bf16.mxu0 %vm2953_vm2, %v2952_v13 }
 0x59b   : > { %2595 = vmatprep.subr.bf16.mxu0 %v2952_v13 }
 0x59e   : > { %2596 = vmatpush3.bf16.msra.mxu0 %v3087_v23 }
 0x59f   : > { %2609 = vmatprep.subr.bf16.mxu0 %v2952_v13 }
 0x66c   : > { %v811_v30 = vpop.f32.mrb[4].mxu0 }
 0x66d   : > { %v824_v31 = vadd.f32 %v811_v30, %v3130_v43  ;;  %v2583_v33 = vpop.f32.mrb[5].mxu0  ;;  %v817_v38 = vadd.f32 %v811_v30, %v3122_v34 }
 0x66e   : > { %v814_v35 = vpop.f32.mrb[6].mxu0 }
 0x66f   : > { %826 = vrot.lane.b32.xlu1 %v824_v31, %s2954_s24  ;;  %v2584_v37 = vpop.f32.mrb[7].mxu0  ;;  %v2410_v41 = vmul.f32 -1.442695, %v817_v38 }
 0x671   : > { %2780 = vpow2.f32 %v2410_v41 }
 0x67b   : > { %v2781_v42 = vpop.eup %2780 }
 0x67c   : > { %v821_v44 = vadd.f32 1.0, %v2781_v42 }
 0x67e   : > { %2782 = vrcp.f32 %v821_v44 }
 0x688   : > { %v2783_v45 = vpop.eup %2782 }
 0x689   : > { %v836_v51 = vsub.f32 1.0, %v2783_v45  ;;  %v842_v53 = vmul.f32 %v2783_v45, %v3153_v25 }
 0x6e1   : > { %v827_v46 = vpop.permute.xlu1 %826 }
 0x6e2   : > { %v829_v47 = vmul.f32 %v2783_v45, %v827_v46 }
 0x6e4   : > { %831 = vrot.lane.b32.xlu0 %v829_v47, %s2954_s24 }
 0x756   : > { %v832_v48 = vpop.permute.xlu0 %831 }
 0x757   : > { %v834_v49 = vadd.f32 %v832_v48, %v3122_v34 }
 0x759   : > { %2784 = vtanh.f32 %v834_v49 }
 0x763   : > { %v2785_v50 = vpop.eup %2784 }
 0x764   : > { %838 = vrot.lane.b32.xlu1 %v2785_v50, %s2956_s18 }
 0x7d6   : > { %v839_v52 = vpop.permute.xlu1 %838 }
 0x7d7   : > { %v841_v54 = vmul.f32 %v839_v52, %v836_v51 }
 0x7d9   : > { %v3172_v55 = vadd.f32 %v842_v53, %v841_v54 }
 0x7db   : > { %v844_v56 = vpack.c.bf16 %v3172_v55, %v3172_v55 }
 0x7dd   : > { %846 = vrot.lane.b32.xlu0 %v844_v56, %s2956_s18 }
 0x84f   : > { %v847_v57 = vpop.permute.xlu0 %846 }
 0x850   : > { %2590 = vmatmul.mubr.msk.bf16.vlgmr.msra.gmra.mrb[12].mxu1 %vm617_vm3, %v847_v57 }
 0x851   : > { %2602 = vmatpush3.bf16.msra.mxu1 %v3078_v10  ;;  %2605 = vmatprep.mubr.msk.bf16.mxu1 %vm2953_vm2, %v2952_v13 }
 0x852   : > { %2603 = vmatprep.subr.bf16.mxu1 %v2952_v13 }
 0x855   : > { %2604 = vmatpush3.bf16.msra.mxu1 %v3087_v23 }
 0x856   : > { %2617 = vmatprep.subr.bf16.mxu1 %v2952_v13 }
 0x923   : > { %v885_v34 = vpop.f32.mrb[12].mxu1 }
 0x924   : > { %v898_v58 = vadd.f32 %v885_v34, %v3130_v43  ;;  %v2591_v59 = vpop.f32.mrb[13].mxu1  ;;  %v891_v62 = vadd.f32 %v885_v34, %v3128_v40 }
 0x925   : > { %v888_v60 = vpop.f32.mrb[14].mxu1 }
 0x926   : > { %900 = vrot.lane.b32.xlu1 %v898_v58, %s2954_s24  ;;  %v2592_v61 = vpop.f32.mrb[15].mxu1  ;;  %v2412_v63 = vmul.f32 -1.442695, %v891_v62 }
 0x928   : > { %2786 = vpow2.f32 %v2412_v63 }
 0x932   : > { %v2787_v1 = vpop.eup %2786 }
 0x933   : > { %v895_v2 = vadd.f32 1.0, %v2787_v1 }
 0x935   : > { %2788 = vrcp.f32 %v895_v2 }
 0x93f   : > { %v2789_v3 = vpop.eup %2788 }
 0x940   : > { %v910_v9 = vsub.f32 1.0, %v2789_v3  ;;  %v916_v12 = vmul.f32 %v2789_v3, %v3172_v55 }
 0x998   : > { %v901_v4 = vpop.permute.xlu1 %900 }
 0x999   : > { %v903_v5 = vmul.f32 %v2789_v3, %v901_v4 }
 0x99b   : > { %905 = vrot.lane.b32.xlu0 %v903_v5, %s2954_s24 }
 0xa0d   : > { %v906_v6 = vpop.permute.xlu0 %905 }
 0xa0e   : > { %v908_v7 = vadd.f32 %v906_v6, %v3128_v40 }
 0xa10   : > { %2790 = vtanh.f32 %v908_v7 }
 0xa1a   : > { %v2791_v8 = vpop.eup %2790 }
 0xa1b   : > { %912 = vrot.lane.b32.xlu1 %v2791_v8, %s2956_s18 }
 0xa8d   : > { %v913_v11 = vpop.permute.xlu1 %912 }
 0xa8e   : > { %v915_v14 = vmul.f32 %v913_v11, %v910_v9 }
 0xa90   : > { %v3191_v15 = vadd.f32 %v916_v12, %v915_v14 }
 0xa92   : > { %v918_v16 = vpack.c.bf16 %v3191_v15, %v3191_v15 }
 0xa94   : > { %920 = vrot.lane.b32.xlu0 %v918_v16, %s2956_s18 }
 0xb06   : > { %v921_v17 = vpop.permute.xlu0 %920 }
 0xb07   : > { %2598 = vmatmul.mubr.msk.bf16.vlgmr.msra.gmra.mrb[8].mxu0 %vm617_vm3, %v921_v17 }
 0xb08   : > { %2610 = vmatpush3.bf16.msra.mxu0 %v3078_v10  ;;  %2613 = vmatprep.mubr.msk.bf16.mxu0 %vm2953_vm2, %v2952_v13 }
 0xb09   : > { %2611 = vmatprep.subr.bf16.mxu0 %v2952_v13 }
 0xb0c   : > { %2612 = vmatpush3.bf16.msra.mxu0 %v3087_v23 }
 0xbda   : > { %v959_v40 = vpop.f32.mrb[8].mxu0 }
 0xbdb   : > { %v972_v18 = vadd.f32 %v959_v40, %v3130_v43  ;;  %v2599_v19 = vpop.f32.mrb[9].mxu0  ;;  %v965_v22 = vadd.f32 %v959_v40, %v3120_v32 }
 0xbdc   : > { %v962_v20 = vpop.f32.mrb[10].mxu0 }
 0xbdd   : > { %974 = vrot.lane.b32.xlu1 %v972_v18, %s2954_s24  ;;  %v2600_v21 = vpop.f32.mrb[11].mxu0  ;;  %v2414_v24 = vmul.f32 -1.442695, %v965_v22  ;;  %v2760_v20 = vld [vmem:[%s3541_s5] sm:$0xff]   ;;  %v1214_v22 = vpack.c.bf16 %v3153_v25, %v3136_v0  ;;  %v1215_v25 = vpack.c.bf16 %v3191_v15, %v3172_v55 }
 0xbde   : > { %2625 = vmatprep.subr.bf16.mxu0 %v2760_v20 }
 0xbdf   : > { %2792 = vpow2.f32 %v2414_v24  ;;  %v2761_v24 = vld [vmem:[%s3541_s5 + $0x8] sm:$0xff]  }
 0xbe9   : > { %v2793_v27 = vpop.eup %2792 }
 0xbea   : > { %v969_v28 = vadd.f32 1.0, %v2793_v27 }
 0xbec   : > { %2794 = vrcp.f32 %v969_v28 }
 0xbf6   : > { %v2795_v30 = vpop.eup %2794 }
 0xbf7   : > { %v984_v41 = vsub.f32 1.0, %v2795_v30  ;;  %v990_v44 = vmul.f32 %v2795_v30, %v3191_v15 }
 0xc4f   : > { %v975_v31 = vpop.permute.xlu1 %974 }
 0xc50   : > { %v977_v33 = vmul.f32 %v2795_v30, %v975_v31 }
 0xc52   : > { %979 = vrot.lane.b32.xlu0 %v977_v33, %s2954_s24 }
 0xcc4   : > { %v980_v35 = vpop.permute.xlu0 %979 }
 0xcc5   : > { %v982_v37 = vadd.f32 %v980_v35, %v3120_v32 }
 0xcc7   : > { %2796 = vtanh.f32 %v982_v37 }
 0xcd1   : > { %v2797_v38 = vpop.eup %2796 }
 0xcd2   : > { %986 = vrot.lane.b32.xlu1 %v2797_v38, %s2956_s18  ;;  %v2762_v38 = vld [vmem:[%s3543_s7] sm:$0xff]  }
 0xd44   : > { %v987_v42 = vpop.permute.xlu1 %986 }
 0xd45   : > { %v989_v45 = vmul.f32 %v987_v42, %v984_v41  ;;  %v2763_v41 = vld [vmem:[%s3543_s7 + $0x8] sm:$0xff]  }
 0xd47   : > { %v3209_v46 = vadd.f32 %v990_v44, %v989_v45  ;;  %v3272_v45 = vld [vmem:[%s3542_s6] ss:$0 sm:$0xff] }
 0xd49   : > { %v992_v47 = vpack.c.bf16 %v3209_v46, %v3209_v46 }
 0xd4b   : > { %994 = vrot.lane.b32.xlu0 %v992_v47, %s2956_s18 }
 0xdbd   : > { %v995_v48 = vpop.permute.xlu0 %994 }
 0xdbe   : > { %2606 = vmatmul.mubr.msk.bf16.vlgmr.msra.gmra.mrb[16].mxu1 %vm617_vm3, %v995_v48 }
 0xdbf   : > { %2618 = vmatpush3.bf16.msra.mxu1 %v3078_v10  ;;  %2621 = vmatprep.mubr.msk.bf16.mxu1 %vm2953_vm2, %v2952_v13 }
 0xdc0   : > { %2619 = vmatprep.subr.bf16.mxu1 %v2952_v13 }
 0xdc3   : > { %2620 = vmatpush3.bf16.msra.mxu1 %v3087_v23 }
 0xdc4   : > { %2637 = vmatprep.subr.bf16.mxu1 %v2762_v38 }
 0xe91   : > { %v1033_v32 = vpop.f32.mrb[16].mxu1 }
 0xe92   : > { %v1046_v49 = vadd.f32 %v1033_v32, %v3130_v43  ;;  %v2607_v50 = vpop.f32.mrb[17].mxu1  ;;  %v1039_v53 = vadd.f32 %v1033_v32, %v3126_v39 }
 0xe93   : > { %v1036_v51 = vpop.f32.mrb[18].mxu1 }
 0xe94   : > { %1048 = vrot.lane.b32.xlu1 %v1046_v49, %s2954_s24  ;;  %v2608_v52 = vpop.f32.mrb[19].mxu1  ;;  %v2416_v54 = vmul.f32 -1.442695, %v1039_v53 }
 0xe96   : > { %2798 = vpow2.f32 %v2416_v54 }
 0xea0   : > { %v2799_v10 = vpop.eup %2798 }
 0xea1   : > { %v1043_v56 = vadd.f32 1.0, %v2799_v10 }
 0xea3   : > { %2800 = vrcp.f32 %v1043_v56 }
 0xead   : > { %v2801_v57 = vpop.eup %2800 }
 0xeae   : > { %v1058_v61 = vsub.f32 1.0, %v2801_v57  ;;  %v1064_v63 = vmul.f32 %v2801_v57, %v3209_v46 }
 0xf06   : > { %v1049_v34 = vpop.permute.xlu1 %1048 }
 0xf07   : > { %v1051_v58 = vmul.f32 %v2801_v57, %v1049_v34 }
 0xf09   : > { %1053 = vrot.lane.b32.xlu0 %v1051_v58, %s2954_s24 }
 0xf7b   : > { %v1054_v23 = vpop.permute.xlu0 %1053 }
 0xf7c   : > { %v1056_v59 = vadd.f32 %v1054_v23, %v3126_v39 }
 0xf7e   : > { %2802 = vtanh.f32 %v1056_v59 }
 0xf88   : > { %v2803_v60 = vpop.eup %2802 }
 0xf89   : > { %1060 = vrot.lane.b32.xlu1 %v2803_v60, %s2956_s18 }
 0xffb   : > { %v1061_v62 = vpop.permute.xlu1 %1060 }
 0xffc   : > { %v1063_v1 = vmul.f32 %v1061_v62, %v1058_v61 }
 0xffe   : > { %v3227_v2 = vadd.f32 %v1064_v63, %v1063_v1 }
0x1000   : > { %v1066_v3 = vpack.c.bf16 %v3227_v2, %v3227_v2 }
0x1002   : > { %1068 = vrot.lane.b32.xlu0 %v1066_v3, %s2956_s18 }
0x1074   : > { %v1069_v4 = vpop.permute.xlu0 %1068 }
0x1075   : > { %2614 = vmatmul.mubr.msk.bf16.vlgmr.msra.gmra.mrb[12].mxu0 %vm617_vm3, %v1069_v4 }
0x1076   : > { %2626 = vmatpush3.bf16.msra.mxu0 %v2760_v20  ;;  %v3291_v20 = vld [vmem:[%s3544_s8] sm:$0xff]  }
0x1077   : > { %2627 = vmatprep.subr.bf16.mxu0 %v2761_v24 }
0x107a   : > { %2628 = vmatpush3.bf16.msra.mxu0 %v2761_v24  ;;  %v3309_v24 = vld [vmem:[%s3544_s8 + $0x8] sm:$0xff]  }
0x107b   : > { %2649 = vmatprep.subr.bf16.mxu0 %v2952_v13 }
0x1148   : > { %v1107_v39 = vpop.f32.mrb[12].mxu0 }
0x1149   : > { %v1120_v5 = vadd.f32 %v1107_v39, %v3130_v43  ;;  %v2615_v6 = vpop.f32.mrb[13].mxu0  ;;  %v1113_v9 = vadd.f32 %v1107_v39, %v3118_v29 }
0x114a   : > { %v1110_v7 = vpop.f32.mrb[14].mxu0 }
0x114b   : > { %1122 = vrot.lane.b32.xlu1 %v1120_v5, %s2954_s24  ;;  %v2616_v8 = vpop.f32.mrb[15].mxu0  ;;  %v2418_v11 = vmul.f32 -1.442695, %v1113_v9 }
0x114d   : > { %2804 = vpow2.f32 %v2418_v11 }
0x1157   : > { %v2805_v12 = vpop.eup %2804 }
0x1158   : > { %v1117_v14 = vadd.f32 1.0, %v2805_v12 }
0x115a   : > { %2806 = vrcp.f32 %v1117_v14 }
0x1164   : > { %v2807_v16 = vpop.eup %2806 }
0x1165   : > { %v1138_v28 = vmul.f32 %v2807_v16, %v3227_v2 }
0x11bd   : > { %v1123_v17 = vpop.permute.xlu1 %1122 }
0x11be   : > { %v1125_v40 = vmul.f32 %v2807_v16, %v1123_v17  ;;  %v1216_v17 = vpack.c.bf16 %v3227_v2, %v3209_v46 }
0x11c0   : > { %1127 = vrot.lane.b32.xlu0 %v1125_v40, %s2954_s24 }
0x1232   : > { %v1128_v18 = vpop.permute.xlu0 %1127 }
0x1233   : > { %v1130_v19 = vadd.f32 %v1128_v18, %v3118_v29  ;;  %v1132_v29 = vsub.f32 1.0, %v2807_v16 }
0x1235   : > { %2808 = vtanh.f32 %v1130_v19 }
0x123f   : > { %v2809_v21 = vpop.eup %2808 }
0x1240   : > { %1134 = vrot.lane.b32.xlu1 %v2809_v21, %s2956_s18 }
0x1244   : > { %1233 = vrot.lane.b32.xlu1 %v1214_v22, %s2956_s18 }
0x12b2   : > { %v1135_v27 = vpop.permute.xlu1 %1134 }
0x12b3   : > { %v1137_v30 = vmul.f32 %v1135_v27, %v1132_v29 }
0x12b5   : > { %v3250_v31 = vadd.f32 %v1138_v28, %v1137_v30 }
0x12b6   : > { %v1234_v33 = vpop.permute.xlu1 %1233 }
0x12b7   : > { %2629 = vmatprep.mubr.msk.bf16.mxu0 %vm617_vm3, %v1234_v33  ;;  %v1140_v0 = vpack.c.bf16 %v3250_v31, %v3250_v31  ;;  %v2446_v33 = vld [vmem:[%s3546_s10] ss:$0 sm:$0xff] }
0x12b9   : > { %1142 = vrot.lane.b32.xlu0 %v1140_v0, %s2956_s18 }
0x12bd   : > { %1235 = vrot.lane.b32.xlu0 %v1215_v25, %s2956_s18 }
0x132b   : > { %v1143_v35 = vpop.permute.xlu0 %1142 }
0x132c   : > { %2622 = vmatmul.mubr.msk.bf16.vlgmr.msra.gmra.mrb[20].mxu1 %vm617_vm3, %v1143_v35 }
0x132d   : > { %2638 = vmatpush3.bf16.msra.mxu1 %v2762_v38 }
0x132e   : > { %2639 = vmatprep.subr.bf16.mxu1 %v2763_v41 }
0x132f   : > { %v1236_v37 = vpop.permute.xlu0 %1235 }
0x1330   : > { %2630 = vmatmul.mubr.msk.bf16.vlgmr.msra.gmra.mrb[16].mxu0 %vm617_vm3, %v1236_v37 }
0x1331   : > { %2640 = vmatpush3.bf16.msra.mxu1 %v2763_v41  ;;  %2650 = vmatpush3.bf16.msra.mxu0 %v3291_v20 }
0x1332   : > { %2657 = vmatprep.subr.bf16.mxu1 %v2952_v13  ;;  %2651 = vmatprep.subr.bf16.mxu0 %v2952_v13 }
0x1335   : > { %2652 = vmatpush3.bf16.msra.mxu0 %v3309_v24 }
0x1336   : > { %2665 = vmatprep.subr.bf16.mxu0 %v2952_v13 }
0x13ff   : > { %v1181_v55 = vpop.f32.mrb[20].mxu1 }
0x1400   : > { %v1194_v15 = vadd.f32 %v1181_v55, %v3130_v43  ;;  %v2623_v42 = vpop.f32.mrb[21].mxu1  ;;  %v1187_v7 = vadd.f32 %v1181_v55, %v3124_v36 }
0x1401   : > { %v1184_v44 = vpop.f32.mrb[22].mxu1 }
0x1402   : > { %1196 = vrot.lane.b32.xlu1 %v1194_v15, %s2954_s24  ;;  %v2624_v47 = vpop.f32.mrb[23].mxu1  ;;  %v2420_v8 = vmul.f32 -1.442695, %v1187_v7 }
0x1403   : > { %v2631_v48 = vpop.f32.mrb[16].mxu0 }
0x1404   : > { %v1308_v32 = vadd.f32 %v2631_v48, %v3272_v45  ;;  %v1299_v49 = vpop.f32.mrb[17].mxu0 }
0x1405   : > { %v1300_v50 = vadd.f32 %v3272_v45, %v1299_v49  ;;  %v2632_v51 = vpop.f32.mrb[18].mxu0 }
0x1406   : > { %v2430_v52 = vmul.f32 -1.442695, %v1308_v32  ;;  %v1311_v43 = vadd.f32 %v2632_v51, %v3272_v45  ;;  %v1302_v53 = vpop.f32.mrb[19].mxu0 }
0x1407   : > { %v2428_v54 = vmul.f32 -1.442695, %v1300_v50  ;;  %v1303_v10 = vadd.f32 %v3272_v45, %v1302_v53 }
0x1408   : > { %2810 = vpow2.f32 %v2430_v52  ;;  %v2431_v56 = vmul.f32 -1.442695, %v1311_v43 }
0x1409   : > { %2812 = vpow2.f32 %v2428_v54  ;;  %v2429_v57 = vmul.f32 -1.442695, %v1303_v10 }
0x140a   : > { %2814 = vpow2.f32 %v2431_v56 }
0x140b   : > { %2816 = vpow2.f32 %v2429_v57 }
0x1412   : > { %v2811_v34 = vpop.eup %2810 }
0x1413   : > { %v2813_v58 = vpop.eup %2812  ;;  %v1356_v23 = vadd.f32 1.0, %v2811_v34 }
0x1414   : > { %v2815_v59 = vpop.eup %2814  ;;  %v1354_v60 = vadd.f32 1.0, %v2813_v58 }
0x1415   : > { %v2817_v61 = vpop.eup %2816  ;;  %2818 = vrcp.f32 %v1356_v23  ;;  %v1357_v62 = vadd.f32 1.0, %v2815_v59 }
0x1416   : > { %2820 = vrcp.f32 %v1354_v60  ;;  %v1355_v63 = vadd.f32 1.0, %v2817_v61 }
0x1417   : > { %2822 = vrcp.f32 %v1357_v62 }
0x1418   : > { %2824 = vrcp.f32 %v1355_v63 }
0x1419   : > { %2826 = vpow2.f32 %v2420_v8 }
0x141f   : > { %v2819_v1 = vpop.eup %2818 }
0x1420   : > { %v2821_v3 = vpop.eup %2820 }
0x1421   : > { %v2823_v4 = vpop.eup %2822 }
0x1422   : > { %v2825_v39 = vpop.eup %2824  ;;  %v1379_v5 = vpack.c.bf16 %v2823_v4, %v2819_v1 }
0x1423   : > { %v1378_v6 = vpack.c.bf16 %v2825_v39, %v2821_v3  ;;  %v2827_v9 = vpop.eup %2826  ;;  %v3347_v3 = vld [vmem:[%s3545_s9] ss:$0 sm:$0xff] }
0x1424   : > { %v1191_v11 = vadd.f32 1.0, %v2827_v9 }
0x1425   : > { %2641 = vmatprep.mubr.msk.bf16.mxu1 %vm617_vm3, %v1378_v6 }
0x1426   : > { %2642 = vmatmul.mubr.msk.bf16.vlgmr.msra.gmra.mrb[24].mxu1 %vm617_vm3, %v1379_v5  ;;  %2828 = vrcp.f32 %v1191_v11 }
0x1427   : > { %2658 = vmatpush3.bf16.msra.mxu1 %v3291_v20 }
0x1428   : > { %2659 = vmatprep.subr.bf16.mxu1 %v2952_v13 }
0x142b   : > { %2660 = vmatpush3.bf16.msra.mxu1 %v3309_v24 }
0x142c   : > { %2673 = vmatprep.subr.bf16.mxu1 %v2952_v13 }
0x1430   : > { %v2829_v12 = vpop.eup %2828 }
0x1431   : > { %v1206_v29 = vsub.f32 1.0, %v2829_v12  ;;  %v1212_v28 = vmul.f32 %v2829_v12, %v3250_v31 }
0x1474   : > { %v1197_v14 = vpop.permute.xlu1 %1196 }
0x1475   : > { %v1199_v16 = vmul.f32 %v2829_v12, %v1197_v14 }
0x1477   : > { %1201 = vrot.lane.b32.xlu0 %v1199_v16, %s2954_s24 }
0x147b   : > { %1237 = vrot.lane.b32.xlu0 %v1216_v17, %s2956_s18 }
0x147f   : > { %1551 = vrot.lane.b32.xlu0 %v2446_v33, %s2954_s24 }
0x14e9   : > { %v1202_v40 = vpop.permute.xlu0 %1201 }
0x14ea   : > { %v1204_v18 = vadd.f32 %v1202_v40, %v3124_v36 }
0x14ec   : > { %2830 = vtanh.f32 %v1204_v18 }
0x14ed   : > { %v1238_v19 = vpop.permute.xlu0 %1237 }
0x14ee   : > { %2633 = vmatprep.mubr.msk.bf16.mxu0 %vm617_vm3, %v1238_v19 }
0x14f1   : > { %v3336_v49 = vpop.permute.xlu0 %1551 }
0x14f6   : > { %v2831_v46 = vpop.eup %2830 }
0x14f7   : > { %1208 = vrot.lane.b32.xlu1 %v2831_v46, %s2956_s18 }
0x14f9   : > { %v3298_v36 = vpop.f32.mrb[24].mxu1 }
0x14fa   : > { %v3300_v2 = vpop.f32.mrb[25].mxu1 }
0x14fb   : > { %v3302_v21 = vpop.f32.mrb[26].mxu1  ;;  %v1452_v4 = vadd.f32 %v3347_v3, %v3300_v2 }
0x14fc   : > { %v3304_v22 = vpop.f32.mrb[27].mxu1 }
0x1569   : > { %v1209_v27 = vpop.permute.xlu1 %1208 }
0x156a   : > { %v1211_v30 = vmul.f32 %v1209_v27, %v1206_v29 }
0x156c   : > { %v1213_v0 = vadd.f32 %v1212_v28, %v1211_v30 }
0x156e   : > { %v1217_v25 = vpack.c.bf16 %v1213_v0, %v3250_v31 }
0x1570   : > { %1239 = vrot.lane.b32.xlu1 %v1217_v25, %s2956_s18 }
0x15e2   : > { %v1240_v35 = vpop.permute.xlu1 %1239 }
0x15e3   : > { %2634 = vmatmul.mubr.msk.bf16.gmra.mrb[20].mxu0 %vm617_vm3, %v1240_v35 }
0x15e4   : > { %2653 = vmatprep.mubr.msk.bf16.mxu0 %vm2953_vm2, %v2952_v13 }
0x15eb   : > { %2654 = vmatmul.mubr.bf16.vlgmr.msra.gmra.mrb[24].mxu0 %v2955_v26 }
0x15ec   : > { %2666 = vmatpush3.bf16.msra.mxu0 %v3291_v20  ;;  %2669 = vmatprep.mubr.msk.bf16.mxu0 %vm2953_vm2, %v2952_v13 }
0x15ed   : > { %2667 = vmatprep.subr.bf16.mxu0 %v2952_v13 }
0x15f0   : > { %2668 = vmatpush3.bf16.msra.mxu0 %v3309_v24 }
0x15f1   : > { %2681 = vmatprep.subr.bf16.mxu0 %v2952_v13 }
0x16b6   : > { %v2635_v31 = vpop.f32.mrb[20].mxu0 }
0x16b7   : > { %v1324_v37 = vadd.f32 %v2635_v31, %v3272_v45  ;;  %v1315_v38 = vpop.f32.mrb[21].mxu0 }
0x16b8   : > { %v1316_v41 = vadd.f32 %v3272_v45, %v1315_v38  ;;  %v2636_v55 = vpop.f32.mrb[22].mxu0  ;;  %v1455_v38 = vadd.f32 %v3347_v3, %v3304_v22 }
0x16b9   : > { %v2434_v15 = vmul.f32 -1.442695, %v1324_v37  ;;  %v1327_v26 = vadd.f32 %v2636_v55, %v3272_v45  ;;  %v1318_v42 = vpop.f32.mrb[23].mxu0 }
0x16ba   : > { %v2432_v44 = vmul.f32 -1.442695, %v1316_v41  ;;  %v1319_v47 = vadd.f32 %v3272_v45, %v1318_v42 }
0x16bb   : > { %2832 = vpow2.f32 %v2434_v15  ;;  %v2435_v48 = vmul.f32 -1.442695, %v1327_v26 }
0x16bc   : > { %2834 = vpow2.f32 %v2432_v44  ;;  %v2433_v32 = vmul.f32 -1.442695, %v1319_v47 }
0x16bd   : > { %2836 = vpow2.f32 %v2435_v48 }
0x16be   : > { %2838 = vpow2.f32 %v2433_v32  ;;  %v1533_v50 = vpop.f32.mrb[24].mxu0 }
0x16bf   : > { %v2655_v51 = vpop.f32.mrb[25].mxu0  ;;  %v1554_v52 = vadd.f32 %v3336_v49, %v1533_v50  ;;  %v1539_v39 = vadd.f32 %v1533_v50, %v1452_v4 }
0x16c0   : > { %v1536_v43 = vpop.f32.mrb[26].mxu0 }
0x16c1   : > { %v2656_v53 = vpop.f32.mrb[27].mxu0  ;;  %1556 = vrot.lane.b32.xlu1 %v1554_v52, %s2954_s24  ;;  %v2445_v5 = vmul.f32 -1.442695, %v1539_v39 }
0x16c5   : > { %v2833_v54 = vpop.eup %2832 }
0x16c6   : > { %v2835_v10 = vpop.eup %2834  ;;  %v1360_v56 = vadd.f32 1.0, %v2833_v54 }
0x16c7   : > { %v2837_v45 = vpop.eup %2836  ;;  %v1358_v57 = vadd.f32 1.0, %v2835_v10 }
0x16c8   : > { %v2839_v34 = vpop.eup %2838  ;;  %2840 = vrcp.f32 %v1360_v56  ;;  %v1361_v58 = vadd.f32 1.0, %v2837_v45 }
0x16c9   : > { %2842 = vrcp.f32 %v1358_v57  ;;  %v1359_v23 = vadd.f32 1.0, %v2839_v34 }
0x16ca   : > { %2844 = vrcp.f32 %v1361_v58 }
0x16cb   : > { %2846 = vrcp.f32 %v1359_v23  ;;  %v1460_v23 = vadd.f32 %v3298_v36, %v3347_v3 }
0x16cc   : > { %2848 = vpow2.f32 %v2445_v5 }
0x16d2   : > { %v2841_v59 = vpop.eup %2840 }
0x16d3   : > { %v2843_v60 = vpop.eup %2842 }
0x16d4   : > { %v2845_v61 = vpop.eup %2844 }
0x16d5   : > { %v2847_v62 = vpop.eup %2846  ;;  %v1381_v63 = vpack.c.bf16 %v2845_v61, %v2841_v59 }
0x16d6   : > { %v1380_v1 = vpack.c.bf16 %v2847_v62, %v2843_v60  ;;  %v2849_v6 = vpop.eup %2848 }
0x16d7   : > { %v1543_v7 = vadd.f32 1.0, %v2849_v6 }
0x16d8   : > { %2645 = vmatprep.mubr.msk.bf16.mxu1 %vm617_vm3, %v1380_v1 }
0x16d9   : > { %2646 = vmatmul.mubr.msk.bf16.gmra.mrb[28].mxu1 %vm617_vm3, %v1381_v63  ;;  %2850 = vrcp.f32 %v1543_v7 }
0x16da   : > { %2661 = vmatprep.mubr.msk.bf16.mxu1 %vm2953_vm2, %v2952_v13 }
0x16e3   : > { %v2851_v8 = vpop.eup %2850 }
0x16e4   : > { %v1566_v46 = vsub.f32 1.0, %v2851_v8  ;;  %v1572_v29 = vmul.f32 0.0, %v2851_v8 }
0x1733   : > { %v1557_v9 = vpop.permute.xlu1 %1556 }
0x1734   : > { %v1559_v11 = vmul.f32 %v2851_v8, %v1557_v9 }
0x1736   : > { %1561 = vrot.lane.b32.xlu0 %v1559_v11, %s2954_s24 }
0x17a8   : > { %v1562_v12 = vpop.permute.xlu0 %1561 }
0x17a9   : > { %v1564_v14 = vadd.f32 %v1562_v12, %v1452_v4 }
0x17ab   : > { %2852 = vtanh.f32 %v1564_v14 }
0x17ac   : > { %v3352_v16 = vpop.f32.mrb[28].mxu1 }
0x17ad   : > { %v3354_v17 = vpop.f32.mrb[29].mxu1 }
0x17ae   : > { %v3356_v40 = vpop.f32.mrb[30].mxu1 }
0x17af   : > { %v3358_v18 = vpop.f32.mrb[31].mxu1 }
0x17b5   : > { %v2853_v19 = vpop.eup %2852 }
0x17b6   : > { %1568 = vrot.lane.b32.xlu1 %v2853_v19, %s2956_s18 }
0x1828   : > { %v1569_v2 = vpop.permute.xlu1 %1568 }
0x1829   : > { %v1571_v27 = vmul.f32 %v1569_v2, %v1566_v46 }
0x182b   : > { %v3361_v28 = vadd.f32 %v1572_v29, %v1571_v27 }
0x182d   : > { %v1574_v30 = vpack.c.bf16 %v3361_v28, %v3361_v28 }
0x182f   : > { %1576 = vrot.lane.b32.xlu0 %v1574_v30, %s2956_s18  ;;  %v1463_v30 = vadd.f32 %v3302_v21, %v3347_v3 }
0x18a1   : > { %v1577_v33 = vpop.permute.xlu0 %1576 }
0x18a2   : > { %2662 = vmatmul.mubr.msk.bf16.vlgmr.msra.gmra.mrb[32].mxu1 %vm617_vm3, %v1577_v33 }
0x18a3   : > { %2674 = vmatpush3.bf16.msra.mxu1 %v3291_v20  ;;  %2677 = vmatprep.mubr.msk.bf16.mxu1 %vm2953_vm2, %v2952_v13 }
0x18a4   : > { %2675 = vmatprep.subr.bf16.mxu1 %v2952_v13 }
0x18a7   : > { %2676 = vmatpush3.bf16.msra.mxu1 %v3309_v24 }
0x18a8   : > { %2689 = vmatprep.subr.bf16.mxu1 %v2952_v13 }
0x1975   : > { %v1615_v0 = vpop.f32.mrb[32].mxu1 }
0x1976   : > { %v1628_v25 = vadd.f32 %v1615_v0, %v3336_v49  ;;  %v2663_v35 = vpop.f32.mrb[33].mxu1  ;;  %v1621_v41 = vadd.f32 %v1615_v0, %v1455_v38 }
0x1977   : > { %v1618_v31 = vpop.f32.mrb[34].mxu1 }
0x1978   : > { %1630 = vrot.lane.b32.xlu1 %v1628_v25, %s2954_s24  ;;  %v2664_v37 = vpop.f32.mrb[35].mxu1  ;;  %v2448_v55 = vmul.f32 -1.442695, %v1621_v41 }
0x197a   : > { %2854 = vpow2.f32 %v2448_v55 }
0x1984   : > { %v2855_v15 = vpop.eup %2854 }
0x1985   : > { %v1625_v26 = vadd.f32 1.0, %v2855_v15 }
0x1987   : > { %2856 = vrcp.f32 %v1625_v26 }
0x1991   : > { %v2857_v42 = vpop.eup %2856 }
0x1992   : > { %v1640_v51 = vsub.f32 1.0, %v2857_v42  ;;  %v1646_v22 = vmul.f32 %v2857_v42, %v3361_v28 }
0x19ea   : > { %v1631_v44 = vpop.permute.xlu1 %1630 }
0x19eb   : > { %v1633_v47 = vmul.f32 %v2857_v42, %v1631_v44 }
0x19ed   : > { %1635 = vrot.lane.b32.xlu0 %v1633_v47, %s2954_s24 }
0x1a5f   : > { %v1636_v48 = vpop.permute.xlu0 %1635 }
0x1a60   : > { %v1638_v32 = vadd.f32 %v1636_v48, %v1455_v38 }
0x1a62   : > { %2858 = vtanh.f32 %v1638_v32 }
0x1a6c   : > { %v2859_v50 = vpop.eup %2858 }
0x1a6d   : > { %1642 = vrot.lane.b32.xlu1 %v2859_v50, %s2956_s18 }
0x1adf   : > { %v1643_v52 = vpop.permute.xlu1 %1642 }
0x1ae0   : > { %v1645_v43 = vmul.f32 %v1643_v52, %v1640_v51 }
0x1ae2   : > { %v3380_v53 = vadd.f32 %v1646_v22, %v1645_v43 }
0x1ae4   : > { %v1648_v54 = vpack.c.bf16 %v3380_v53, %v3380_v53 }
0x1ae6   : > { %1650 = vrot.lane.b32.xlu0 %v1648_v54, %s2956_s18  ;;  %v1468_v54 = vadd.f32 %v3347_v3, %v3354_v17 }
0x1b58   : > { %v1651_v10 = vpop.permute.xlu0 %1650 }
0x1b59   : > { %2670 = vmatmul.mubr.msk.bf16.vlgmr.msra.gmra.mrb[28].mxu0 %vm617_vm3, %v1651_v10 }
0x1b5a   : > { %2682 = vmatpush3.bf16.msra.mxu0 %v3291_v20  ;;  %2685 = vmatprep.mubr.msk.bf16.mxu0 %vm2953_vm2, %v2952_v13 }
0x1b5b   : > { %2683 = vmatprep.subr.bf16.mxu0 %v2952_v13 }
0x1b5e   : > { %2684 = vmatpush3.bf16.msra.mxu0 %v3309_v24 }
0x1b5f   : > { %2697 = vmatprep.subr.bf16.mxu0 %v2952_v13 }
0x1c2c   : > { %v1689_v56 = vpop.f32.mrb[28].mxu0 }
0x1c2d   : > { %v1702_v45 = vadd.f32 %v1689_v56, %v3336_v49  ;;  %v2671_v57 = vpop.f32.mrb[29].mxu0  ;;  %v1695_v59 = vadd.f32 %v1689_v56, %v1460_v23 }
0x1c2e   : > { %v1692_v34 = vpop.f32.mrb[30].mxu0 }
0x1c2f   : > { %1704 = vrot.lane.b32.xlu1 %v1702_v45, %s2954_s24  ;;  %v2672_v58 = vpop.f32.mrb[31].mxu0  ;;  %v2450_v60 = vmul.f32 -1.442695, %v1695_v59 }
0x1c31   : > { %2860 = vpow2.f32 %v2450_v60 }
0x1c3b   : > { %v2861_v61 = vpop.eup %2860 }
0x1c3c   : > { %v1699_v62 = vadd.f32 1.0, %v2861_v61 }
0x1c3e   : > { %2862 = vrcp.f32 %v1699_v62 }
0x1c48   : > { %v2863_v63 = vpop.eup %2862 }
0x1c49   : > { %v1714_v7 = vsub.f32 1.0, %v2863_v63  ;;  %v1720_v36 = vmul.f32 %v2863_v63, %v3380_v53 }
0x1ca1   : > { %v1705_v1 = vpop.permute.xlu1 %1704 }
0x1ca2   : > { %v1707_v4 = vmul.f32 %v2863_v63, %v1705_v1 }
0x1ca4   : > { %1709 = vrot.lane.b32.xlu0 %v1707_v4, %s2954_s24 }
0x1d16   : > { %v1710_v39 = vpop.permute.xlu0 %1709 }
0x1d17   : > { %v1712_v5 = vadd.f32 %v1710_v39, %v1460_v23 }
0x1d19   : > { %2864 = vtanh.f32 %v1712_v5 }
0x1d23   : > { %v2865_v6 = vpop.eup %2864 }
0x1d24   : > { %1716 = vrot.lane.b32.xlu1 %v2865_v6, %s2956_s18 }
0x1d96   : > { %v1717_v8 = vpop.permute.xlu1 %1716 }
0x1d97   : > { %v1719_v9 = vmul.f32 %v1717_v8, %v1714_v7 }
0x1d99   : > { %v3399_v11 = vadd.f32 %v1720_v36, %v1719_v9 }
0x1d9b   : > { %v1722_v12 = vpack.c.bf16 %v3399_v11, %v3399_v11 }
0x1d9d   : > { %1724 = vrot.lane.b32.xlu0 %v1722_v12, %s2956_s18  ;;  %v1471_v12 = vadd.f32 %v3347_v3, %v3358_v18 }
0x1e0f   : > { %v1725_v14 = vpop.permute.xlu0 %1724 }
0x1e10   : > { %2678 = vmatmul.mubr.msk.bf16.vlgmr.msra.gmra.mrb[36].mxu1 %vm617_vm3, %v1725_v14 }
0x1e11   : > { %2690 = vmatpush3.bf16.msra.mxu1 %v3291_v20  ;;  %2693 = vmatprep.mubr.msk.bf16.mxu1 %vm2953_vm2, %v2952_v13 }
0x1e12   : > { %2691 = vmatprep.subr.bf16.mxu1 %v2952_v13 }
0x1e15   : > { %2692 = vmatpush3.bf16.msra.mxu1 %v3309_v24 }
0x1e16   : > { %2705 = vmatprep.subr.bf16.mxu1 %v2952_v13 }
0x1ee3   : > { %v1763_v19 = vpop.f32.mrb[36].mxu1 }
0x1ee4   : > { %v1776_v46 = vadd.f32 %v1763_v19, %v3336_v49  ;;  %v2679_v2 = vpop.f32.mrb[37].mxu1  ;;  %v1769_v33 = vadd.f32 %v1763_v19, %v1463_v30 }
0x1ee5   : > { %v1766_v29 = vpop.f32.mrb[38].mxu1 }
0x1ee6   : > { %1778 = vrot.lane.b32.xlu1 %v1776_v46, %s2954_s24  ;;  %v2680_v27 = vpop.f32.mrb[39].mxu1  ;;  %v2452_v0 = vmul.f32 -1.442695, %v1769_v33 }
0x1ee8   : > { %2866 = vpow2.f32 %v2452_v0 }
0x1ef2   : > { %v2867_v25 = vpop.eup %2866 }
0x1ef3   : > { %v1773_v35 = vadd.f32 1.0, %v2867_v25 }
0x1ef5   : > { %2868 = vrcp.f32 %v1773_v35 }
0x1eff   : > { %v2869_v31 = vpop.eup %2868 }
0x1f00   : > { %v1788_v26 = vsub.f32 1.0, %v2869_v31  ;;  %v1794_v21 = vmul.f32 %v2869_v31, %v3399_v11 }
0x1f58   : > { %v1779_v37 = vpop.permute.xlu1 %1778 }
0x1f59   : > { %v1781_v38 = vmul.f32 %v2869_v31, %v1779_v37 }
0x1f5b   : > { %1783 = vrot.lane.b32.xlu0 %v1781_v38, %s2954_s24 }
0x1fcd   : > { %v1784_v41 = vpop.permute.xlu0 %1783 }
0x1fce   : > { %v1786_v55 = vadd.f32 %v1784_v41, %v1463_v30 }
0x1fd0   : > { %2870 = vtanh.f32 %v1786_v55 }
0x1fda   : > { %v2871_v15 = vpop.eup %2870 }
0x1fdb   : > { %1790 = vrot.lane.b32.xlu1 %v2871_v15, %s2956_s18 }
0x204d   : > { %v1791_v42 = vpop.permute.xlu1 %1790 }
0x204e   : > { %v1793_v44 = vmul.f32 %v1791_v42, %v1788_v26  ;;  %v1476_v42 = vadd.f32 %v3352_v16, %v3347_v3 }
0x2050   : > { %v3418_v47 = vadd.f32 %v1794_v21, %v1793_v44 }
0x2052   : > { %v1796_v48 = vpack.c.bf16 %v3418_v47, %v3418_v47 }
0x2054   : > { %1798 = vrot.lane.b32.xlu0 %v1796_v48, %s2956_s18 }
0x20c6   : > { %v1799_v32 = vpop.permute.xlu0 %1798 }
0x20c7   : > { %2686 = vmatmul.mubr.msk.bf16.vlgmr.msra.gmra.mrb[32].mxu0 %vm617_vm3, %v1799_v32 }
0x20c8   : > { %2698 = vmatpush3.bf16.msra.mxu0 %v3291_v20  ;;  %2701 = vmatprep.mubr.msk.bf16.mxu0 %vm2953_vm2, %v2952_v13 }
0x20c9   : > { %2699 = vmatprep.subr.bf16.mxu0 %v2952_v13 }
0x20cc   : > { %2700 = vmatpush3.bf16.msra.mxu0 %v3309_v24 }
0x219a   : > { %v1837_v50 = vpop.f32.mrb[32].mxu0 }
0x219b   : > { %v1850_v51 = vadd.f32 %v1837_v50, %v3336_v49  ;;  %v2687_v52 = vpop.f32.mrb[33].mxu0  ;;  %v1843_v10 = vadd.f32 %v1837_v50, %v1468_v54 }
0x219c   : > { %v1840_v22 = vpop.f32.mrb[34].mxu0 }
0x219d   : > { %1852 = vrot.lane.b32.xlu1 %v1850_v51, %s2954_s24  ;;  %v2688_v43 = vpop.f32.mrb[35].mxu0  ;;  %v2454_v56 = vmul.f32 -1.442695, %v1843_v10 }
0x219f   : > { %2872 = vpow2.f32 %v2454_v56 }
0x21a9   : > { %v2873_v45 = vpop.eup %2872 }
0x21aa   : > { %v1847_v57 = vadd.f32 1.0, %v2873_v45 }
0x21ac   : > { %2874 = vrcp.f32 %v1847_v57 }
0x21b6   : > { %v2875_v34 = vpop.eup %2874 }
0x21b7   : > { %v1862_v62 = vsub.f32 1.0, %v2875_v34  ;;  %v1868_v17 = vmul.f32 %v2875_v34, %v3418_v47 }
0x220f   : > { %v1853_v58 = vpop.permute.xlu1 %1852 }
0x2210   : > { %v1855_v23 = vmul.f32 %v2875_v34, %v1853_v58 }
0x2212   : > { %1857 = vrot.lane.b32.xlu0 %v1855_v23, %s2954_s24 }
0x2284   : > { %v1858_v59 = vpop.permute.xlu0 %1857 }
0x2285   : > { %v1860_v60 = vadd.f32 %v1858_v59, %v1468_v54 }
0x2287   : > { %2876 = vtanh.f32 %v1860_v60 }
0x2291   : > { %v2877_v61 = vpop.eup %2876 }
0x2292   : > { %1864 = vrot.lane.b32.xlu1 %v2877_v61, %s2956_s18 }
0x2304   : > { %v1865_v63 = vpop.permute.xlu1 %1864 }
0x2305   : > { %v1867_v1 = vmul.f32 %v1865_v63, %v1862_v62  ;;  %v1479_v63 = vadd.f32 %v3356_v40, %v3347_v3  ;;  %v2766_v3 = vld [vmem:[%s3547_s11] sm:$0xff]  }
0x2306   : > { %2713 = vmatprep.subr.bf16.mxu0 %v2766_v3 }
0x2307   : > { %v3436_v4 = vadd.f32 %v1868_v17, %v1867_v1 }
0x2309   : > { %v1870_v39 = vpack.c.bf16 %v3436_v4, %v3436_v4 }
0x230b   : > { %1872 = vrot.lane.b32.xlu0 %v1870_v39, %s2956_s18 }
0x237d   : > { %v1873_v5 = vpop.permute.xlu0 %1872 }
0x237e   : > { %2694 = vmatmul.mubr.msk.bf16.vlgmr.msra.gmra.mrb[40].mxu1 %vm617_vm3, %v1873_v5 }
0x237f   : > { %2706 = vmatpush3.bf16.msra.mxu1 %v3291_v20  ;;  %2709 = vmatprep.mubr.msk.bf16.mxu1 %vm2953_vm2, %v2952_v13 }
0x2380   : > { %2707 = vmatprep.subr.bf16.mxu1 %v2952_v13 }
0x2383   : > { %2708 = vmatpush3.bf16.msra.mxu1 %v3309_v24 }
0x2451   : > { %v1911_v6 = vpop.f32.mrb[40].mxu1 }
0x2452   : > { %v1924_v7 = vadd.f32 %v1911_v6, %v3336_v49  ;;  %v2695_v8 = vpop.f32.mrb[41].mxu1  ;;  %v1917_v14 = vadd.f32 %v1911_v6, %v1471_v12 }
0x2453   : > { %v1914_v36 = vpop.f32.mrb[42].mxu1 }
0x2454   : > { %1926 = vrot.lane.b32.xlu1 %v1924_v7, %s2954_s24  ;;  %v2696_v9 = vpop.f32.mrb[43].mxu1  ;;  %v2456_v20 = vmul.f32 -1.442695, %v1917_v14  ;;  %v2767_v36 = vld [vmem:[%s3547_s11 + $0x8] sm:$0xff]  }
0x2456   : > { %2878 = vpow2.f32 %v2456_v20 }
0x2460   : > { %v2879_v19 = vpop.eup %2878 }
0x2461   : > { %v1921_v46 = vadd.f32 1.0, %v2879_v19 }
0x2463   : > { %2880 = vrcp.f32 %v1921_v46 }
0x246d   : > { %v2881_v13 = vpop.eup %2880 }
0x246e   : > { %v1936_v33 = vsub.f32 1.0, %v2881_v13  ;;  %v1942_v18 = vmul.f32 %v2881_v13, %v3436_v4 }
0x24c6   : > { %v1927_v2 = vpop.permute.xlu1 %1926 }
0x24c7   : > { %v1929_v24 = vmul.f32 %v2881_v13, %v1927_v2 }
0x24c9   : > { %1931 = vrot.lane.b32.xlu0 %v1929_v24, %s2954_s24 }
0x253b   : > { %v1932_v29 = vpop.permute.xlu0 %1931 }
0x253c   : > { %v1934_v27 = vadd.f32 %v1932_v29, %v1471_v12 }
0x253e   : > { %2882 = vtanh.f32 %v1934_v27 }
0x2548   : > { %v2883_v30 = vpop.eup %2882 }
0x2549   : > { %1938 = vrot.lane.b32.xlu1 %v2883_v30, %s2956_s18 }
0x25bb   : > { %v1939_v0 = vpop.permute.xlu1 %1938 }
0x25bc   : > { %v1941_v25 = vmul.f32 %v1939_v0, %v1936_v33 }
0x25be   : > { %v1943_v35 = vadd.f32 %v1942_v18, %v1941_v25 }
0x25c0   : > { %v1944_v31 = vpack.c.bf16 %v1943_v35, %v1943_v35  ;;  %v2094_v40 = vpack.c.bf16 %v1943_v35, %v3436_v4  ;;  %v2093_v4 = vpack.c.bf16 %v3418_v47, %v3399_v11  ;;  %v2461_v11 = vld [vmem:[%s3548_s12] ss:$0 sm:$0xff] }
0x25c2   : > { %1946 = vrot.lane.b32.xlu0 %v1944_v31, %s2956_s18 }
0x2634   : > { %v1947_v37 = vpop.permute.xlu0 %1946 }
0x2635   : > { %2702 = vmatmul.mubr.msk.bf16.vlgmr.msra.gmra.mrb[36].mxu0 %vm617_vm3, %v1947_v37 }
0x2636   : > { %2714 = vmatpush3.bf16.msra.mxu0 %v2766_v3 }
0x2637   : > { %2715 = vmatprep.subr.bf16.mxu0 %v2767_v36 }
0x263a   : > { %2716 = vmatpush3.bf16.msra.mxu0 %v2767_v36 }
0x2708   : > { %v1985_v38 = vpop.f32.mrb[36].mxu0 }
0x2709   : > { %v1998_v41 = vadd.f32 %v1985_v38, %v3336_v49  ;;  %v2703_v55 = vpop.f32.mrb[37].mxu0  ;;  %v1991_v21 = vadd.f32 %v1985_v38, %v1476_v42 }
0x270a   : > { %v1988_v15 = vpop.f32.mrb[38].mxu0 }
0x270b   : > { %2000 = vrot.lane.b32.xlu1 %v1998_v41, %s2954_s24  ;;  %v2704_v26 = vpop.f32.mrb[39].mxu0  ;;  %v2458_v44 = vmul.f32 -1.442695, %v1991_v21 }
0x270d   : > { %2884 = vpow2.f32 %v2458_v44 }
0x2717   : > { %v2885_v48 = vpop.eup %2884 }
0x2718   : > { %v1995_v32 = vadd.f32 1.0, %v2885_v48 }
0x271a   : > { %2886 = vrcp.f32 %v1995_v32 }
0x2724   : > { %v2887_v50 = vpop.eup %2886 }
0x2725   : > { %v2010_v10 = vsub.f32 1.0, %v2887_v50  ;;  %v2016_v16 = vmul.f32 %v2887_v50, %v1943_v35 }
0x277d   : > { %v2001_v51 = vpop.permute.xlu1 %2000 }
0x277e   : > { %v2003_v52 = vmul.f32 %v2887_v50, %v2001_v51 }
0x2780   : > { %2005 = vrot.lane.b32.xlu0 %v2003_v52, %s2954_s24 }
0x27f2   : > { %v2006_v22 = vpop.permute.xlu0 %2005 }
0x27f3   : > { %v2008_v43 = vadd.f32 %v2006_v22, %v1476_v42 }
0x27f5   : > { %2888 = vtanh.f32 %v2008_v43 }
0x27ff   : > { %v2889_v54 = vpop.eup %2888 }
0x2800   : > { %2012 = vrot.lane.b32.xlu1 %v2889_v54, %s2956_s18 }
0x2872   : > { %v2013_v56 = vpop.permute.xlu1 %2012 }
0x2873   : > { %v2015_v45 = vmul.f32 %v2013_v56, %v2010_v10 }
0x2875   : > { %v2017_v57 = vadd.f32 %v2016_v16, %v2015_v45 }
0x2877   : > { %v2018_v34 = vpack.c.bf16 %v2017_v57, %v2017_v57 }
0x2879   : > { %2020 = vrot.lane.b32.xlu0 %v2018_v34, %s2956_s18 }
0x28eb   : > { %v2021_v58 = vpop.permute.xlu0 %2020 }
0x28ec   : > { %2710 = vmatmul.mubr.msk.bf16.vlgmr.msra.gmra.mrb[44].mxu1 %vm617_vm3, %v2021_v58 }
0x29bf   : > { %v2059_v23 = vpop.f32.mrb[44].mxu1 }
0x29c0   : > { %v2072_v59 = vadd.f32 %v2059_v23, %v3336_v49  ;;  %v2711_v60 = vpop.f32.mrb[45].mxu1  ;;  %v2065_v17 = vadd.f32 %v2059_v23, %v1479_v63  ;;  %v2092_v49 = vpack.c.bf16 %v3380_v53, %v3361_v28 }
0x29c1   : > { %v2062_v61 = vpop.f32.mrb[46].mxu1 }
0x29c2   : > { %2074 = vrot.lane.b32.xlu1 %v2072_v59, %s2954_s24  ;;  %v2712_v62 = vpop.f32.mrb[47].mxu1  ;;  %v2460_v1 = vmul.f32 -1.442695, %v2065_v17 }
0x29c4   : > { %2890 = vpow2.f32 %v2460_v1 }
0x29ce   : > { %v2891_v39 = vpop.eup %2890 }
0x29cf   : > { %v2069_v5 = vadd.f32 1.0, %v2891_v39 }
0x29d1   : > { %2892 = vrcp.f32 %v2069_v5 }
0x29db   : > { %v2893_v6 = vpop.eup %2892 }
0x29dc   : > { %v2084_v14 = vsub.f32 1.0, %v2893_v6  ;;  %v2090_v19 = vmul.f32 %v2893_v6, %v2017_v57 }
0x2a34   : > { %v2075_v7 = vpop.permute.xlu1 %2074 }
0x2a35   : > { %v2077_v8 = vmul.f32 %v2893_v6, %v2075_v7 }
0x2a37   : > { %2079 = vrot.lane.b32.xlu0 %v2077_v8, %s2954_s24 }
0x2a3b   : > { %2111 = vrot.lane.b32.xlu0 %v2092_v49, %s2956_s18 }
0x2a3f   : > { %2115 = vrot.lane.b32.xlu0 %v2094_v40, %s2956_s18 }
0x2aa9   : > { %v2080_v9 = vpop.permute.xlu0 %2079 }
0x2aaa   : > { %v2082_v12 = vadd.f32 %v2080_v9, %v1479_v63 }
0x2aac   : > { %2894 = vtanh.f32 %v2082_v12 }
0x2aad   : > { %v2112_v28 = vpop.permute.xlu0 %2111 }
0x2aae   : > { %2717 = vmatprep.mubr.msk.bf16.mxu0 %vm617_vm3, %v2112_v28 }
0x2ab1   : > { %v2116_v24 = vpop.permute.xlu0 %2115 }
0x2ab6   : > { %v2895_v53 = vpop.eup %2894 }
0x2ab7   : > { %2086 = vrot.lane.b32.xlu1 %v2895_v53, %s2956_s18 }
0x2abb   : > { %2113 = vrot.lane.b32.xlu1 %v2093_v4, %s2956_s18 }
0x2b29   : > { %v2087_v20 = vpop.permute.xlu1 %2086 }
0x2b2a   : > { %v2089_v46 = vmul.f32 %v2087_v20, %v2084_v14 }
0x2b2c   : > { %v2091_v13 = vadd.f32 %v2090_v19, %v2089_v46 }
0x2b2d   : > { %v2114_v2 = vpop.permute.xlu1 %2113 }
0x2b2e   : > { %2718 = vmatmul.mubr.msk.bf16.vlgmr.msra.gmra.mrb[40].mxu0 %vm617_vm3, %v2114_v2  ;;  %v2095_v29 = vpack.c.bf16 %v2091_v13, %v2017_v57 }
0x2b2f   : > { %2721 = vmatprep.mubr.msk.bf16.mxu0 %vm617_vm3, %v2116_v24 }
0x2b30   : > { %2117 = vrot.lane.b32.xlu1 %v2095_v29, %s2956_s18  ;;  %s3493_s18 = scalar_lea.vmem [#allocation3], %s3073_s17  ;;  %s2477_s17 = sshll.u32 (%p3057_p5), %s2389_s28, 3 }
0x2b31   : > { %s2272_s20 = scalar_lea.vmem (%p3057_p5), %s3549_s13, %s2477_s17 }
0x2ba2   : > { %v2118_v27 = vpop.permute.xlu1 %2117 }
0x2ba3   : > { %2722 = vmatmul.mubr.msk.bf16.gmra.mrb[44].mxu0 %vm617_vm3, %v2118_v27 }
0x2c01   : > { %v2719_v47 = vpop.f32.mrb[40].mxu0 }
0x2c02   : > { %v2186_v30 = vadd.f32 %v2719_v47, %v2461_v11  ;;  %v2177_v33 = vpop.f32.mrb[41].mxu0 }
0x2c03   : > { %v2178_v0 = vadd.f32 %v2461_v11, %v2177_v33  ;;  %v2720_v18 = vpop.f32.mrb[42].mxu0 }
0x2c04   : > { %v2470_v25 = vmul.f32 -1.442695, %v2186_v30  ;;  %v2189_v35 = vadd.f32 %v2720_v18, %v2461_v11  ;;  %v2180_v31 = vpop.f32.mrb[43].mxu0 }
0x2c05   : > { %v2468_v37 = vmul.f32 -1.442695, %v2178_v0  ;;  %v2181_v38 = vadd.f32 %v2461_v11, %v2180_v31 }
0x2c06   : > { %2896 = vpow2.f32 %v2470_v25  ;;  %v2471_v41 = vmul.f32 -1.442695, %v2189_v35 }
0x2c07   : > { %2898 = vpow2.f32 %v2468_v37  ;;  %v2469_v55 = vmul.f32 -1.442695, %v2181_v38 }
0x2c08   : > { %2900 = vpow2.f32 %v2471_v41 }
0x2c09   : > { %2902 = vpow2.f32 %v2469_v55 }
0x2c10   : > { %v2897_v15 = vpop.eup %2896 }
0x2c11   : > { %v2899_v26 = vpop.eup %2898  ;;  %v2234_v42 = vadd.f32 1.0, %v2897_v15 }
0x2c12   : > { %v2901_v21 = vpop.eup %2900  ;;  %v2232_v44 = vadd.f32 1.0, %v2899_v26 }
0x2c13   : > { %v2903_v48 = vpop.eup %2902  ;;  %2904 = vrcp.f32 %v2234_v42  ;;  %v2235_v32 = vadd.f32 1.0, %v2901_v21 }
0x2c14   : > { %2906 = vrcp.f32 %v2232_v44  ;;  %v2233_v50 = vadd.f32 1.0, %v2903_v48 }
0x2c15   : > { %2908 = vrcp.f32 %v2235_v32 }
0x2c16   : > { %2910 = vrcp.f32 %v2233_v50 }
0x2c1d   : > { %v2905_v51 = vpop.eup %2904 }
0x2c1e   : > { %v2907_v52 = vpop.eup %2906  ;;  %2258 = vst.msk [vmem:[%s3493_s18 + $0x10] sm:$0xff] %vm518_vm1, %v2905_v51 }
0x2c1f   : > { %v2909_v22 = vpop.eup %2908  ;;  %2256 = vst.msk [vmem:[%s3493_s18] sm:$0xff] %vm518_vm1, %v2907_v52 }
0x2c20   : > { %v2911_v43 = vpop.eup %2910  ;;  %2259 = vst.msk [vmem:[%s3493_s18 + $0x18] sm:$0xff] %vm518_vm1, %v2909_v22 }
0x2c21   : > { %2257 = vst.msk [vmem:[%s3493_s18 + $0x8] sm:$0xff] %vm518_vm1, %v2911_v43 }
0x2c25   : > { %v2318_v12 = vld [vmem:[%s3493_s18 + $0x10] sm:$0xff] (%p3057_p5) }
0x2c26   : > { %v2314_v36 = vld [vmem:[%s3493_s18] sm:$0xff] (%p3057_p5)  ;;  %2319 = vst [vmem:[%s2272_s20 + $0x20] sm:$0xff] (%p3057_p5), %v2318_v12 }
0x2c27   : > { %v2320_v28 = vld [vmem:[%s3493_s18 + $0x18] sm:$0xff] (%p3057_p5)  ;;  %2315 = vst [vmem:[%s2272_s20] sm:$0xff] (%p3057_p5), %v2314_v36 }
0x2c28   : > { %v2316_v9 = vld [vmem:[%s3493_s18 + $0x8] sm:$0xff] (%p3057_p5)  ;;  %2321 = vst [vmem:[%s2272_s20 + $0x30] sm:$0xff] (%p3057_p5), %v2320_v28 }
0x2c29   : > { %2317 = vst [vmem:[%s2272_s20 + $0x10] sm:$0xff] (%p3057_p5), %v2316_v9 }
0x2c76   : > { %v2723_v54 = vpop.f32.mrb[44].mxu0 }
0x2c77   : > { %v2202_v10 = vadd.f32 %v2723_v54, %v2461_v11  ;;  %v2193_v56 = vpop.f32.mrb[45].mxu0 }
0x2c78   : > { %v2194_v16 = vadd.f32 %v2461_v11, %v2193_v56  ;;  %v2724_v45 = vpop.f32.mrb[46].mxu0 }
0x2c79   : > { %v2474_v57 = vmul.f32 -1.442695, %v2202_v10  ;;  %v2205_v34 = vadd.f32 %v2724_v45, %v2461_v11  ;;  %v2196_v58 = vpop.f32.mrb[47].mxu0 }
0x2c7a   : > { %v2472_v23 = vmul.f32 -1.442695, %v2194_v16  ;;  %v2197_v59 = vadd.f32 %v2461_v11, %v2196_v58 }
0x2c7b   : > { %2912 = vpow2.f32 %v2474_v57  ;;  %v2475_v60 = vmul.f32 -1.442695, %v2205_v34 }
0x2c7c   : > { %2914 = vpow2.f32 %v2472_v23  ;;  %v2473_v61 = vmul.f32 -1.442695, %v2197_v59 }
0x2c7d   : > { %2916 = vpow2.f32 %v2475_v60 }
0x2c7e   : > { %2918 = vpow2.f32 %v2473_v61 }
0x2c85   : > { %v2913_v62 = vpop.eup %2912 }
0x2c86   : > { %v2915_v63 = vpop.eup %2914  ;;  %v2238_v17 = vadd.f32 1.0, %v2913_v62 }
0x2c87   : > { %v2917_v1 = vpop.eup %2916  ;;  %v2236_v39 = vadd.f32 1.0, %v2915_v63 }
0x2c88   : > { %v2919_v5 = vpop.eup %2918  ;;  %2920 = vrcp.f32 %v2238_v17  ;;  %v2239_v6 = vadd.f32 1.0, %v2917_v1 }
0x2c89   : > { %2922 = vrcp.f32 %v2236_v39  ;;  %v2237_v7 = vadd.f32 1.0, %v2919_v5 }
0x2c8a   : > { %2924 = vrcp.f32 %v2239_v6 }
0x2c8b   : > { %2926 = vrcp.f32 %v2237_v7 }
0x2c90   : > { %2270 = sbr.rel (!%p3057_p5) target bundleno = 11423 (0x2c9f), region = 114 }
0x2c92   : > { %v2921_v8 = vpop.eup %2920 }
0x2c93   : > { %v2923_v49 = vpop.eup %2922  ;;  %2262 = vst.msk [vmem:[%s3493_s18 + $0x30] sm:$0xff] %vm518_vm1, %v2921_v8 }
0x2c94   : > { %v2925_v3 = vpop.eup %2924  ;;  %2260 = vst.msk [vmem:[%s3493_s18 + $0x20] sm:$0xff] %vm518_vm1, %v2923_v49 }
0x2c95   : > { %v2927_v40 = vpop.eup %2926  ;;  %2263 = vst.msk [vmem:[%s3493_s18 + $0x38] sm:$0xff] %vm518_vm1, %v2925_v3 }
0x2c96   : > { %2261 = vst.msk [vmem:[%s3493_s18 + $0x28] sm:$0xff] %vm518_vm1, %v2927_v40 }
0x2c9a   : > { %v2326_v14 = vld [vmem:[%s3493_s18 + $0x30] sm:$0xff] }
0x2c9b   : > { %v2322_v53 = vld [vmem:[%s3493_s18 + $0x20] sm:$0xff]  ;;  %2327 = vst [vmem:[%s2272_s20 + $0x60] sm:$0xff] %v2326_v14 }
0x2c9c   : > { %2323 = vst [vmem:[%s2272_s20 + $0x40] sm:$0xff] %v2322_v53  ;;  %v2328_v20 = vld [vmem:[%s3493_s18 + $0x38] sm:$0xff] }
0x2c9d   : > { %v2324_v4 = vld [vmem:[%s3493_s18 + $0x28] sm:$0xff]  ;;  %2329 = vst [vmem:[%s2272_s20 + $0x70] sm:$0xff] %v2328_v20 }
0x2c9e   : > { %2325 = vst [vmem:[%s2272_s20 + $0x50] sm:$0xff] %v2324_v4 }
0x2c9f PF: > { %p20_p10 = scmp.ge.s32.totalorder %s3044_s29, 4   ;;  %s3551_s25 = smov %s2946_s26 }
0x2ca0   : > { %s3552_s26 = smov %s3055_s15  ;;  %s3553_s27 = smov %s3044_s29 }
0x2ca1   :  { %22 = sbr.rel (!%p20_p10) target bundleno = 2 (0x2), region = 183 }

</bundles_post_ra>
